<compile_context>
chip_gen: v7x
topology: tpu7x:2x2x1
jax: 0.10.0
libtpu: 0.0.40
codegen_flags: <defaults>
</compile_context>

<pallas_src>
import numpy as np
import jax
import jax.numpy as jnp
from jax import lax
from jax.experimental import pallas as pl
from jax.experimental.pallas import tpu as pltpu

EPS = 1e-5  # PyTorch BatchNorm1d default eps


def _recurrent_net_kernel(
    x_ref,                       # (T*B, D)  time-major-flattened input, f32
    g0_ref, be0_ref,             # (1, D)    bn0 gamma / beta
    wih0_ref, whh0_ref, b0_ref,  # (D,4H) bf16, (H,4H) bf16, (1,4H) f32
    w1_ref, b1_ref,              # (2H,4H) bf16 = [Wih1; Whh1], (1,4H) f32
    h0_ref, c0_ref,              # (L, B, H) initial hidden / cell state, f32
    g1_ref, be1_ref,             # (1, H)    bn1 gamma / beta
    wd_ref, bd_ref,              # (H, O) bf16, (1, O) f32  dense layer
    out_ref,                     # (B, O) output, f32
):
    _, B, H = h0_ref.shape
    TB, D = x_ref.shape
    T = TB // B

    # ---- bn0 (training mode): per-feature stats over all B*T positions ----
    x = x_ref[...]
    mu0 = jnp.mean(x, axis=0, keepdims=True)
    var0 = jnp.mean((x - mu0) ** 2, axis=0, keepdims=True)
    xn = (x - mu0) * lax.rsqrt(var0 + EPS) * g0_ref[...] + be0_ref[...]

    # ---- hoisted layer-0 input projection: one MXU matmul, b0 folded in ----
    xproj = (jnp.dot(xn.astype(jnp.bfloat16), wih0_ref[...],
                     preferred_element_type=jnp.float32)
             + b0_ref[...])                              # (T*B, 4H) f32

    whh0 = whh0_ref[...]                                 # (H, 4H)  bf16
    w1 = w1_ref[...]                                     # (2H, 4H) bf16
    b1 = jnp.broadcast_to(b1_ref[...], (B, 4 * H))       # broadcast hoisted

    h0 = h0_ref[0]
    c0 = c0_ref[0]
    h1 = h0_ref[1]
    c1 = c0_ref[1]

    def gates_to_state(gates, c):
        # PyTorch gate order: i, f, g, o.
        # One full-width sigmoid pass (single EUP push over all 4H lanes)
        # instead of three separate 32-lane sliced sigmoids.
        sig = jax.nn.sigmoid(gates)
        i = sig[:, 0 * H:1 * H]
        f = sig[:, 1 * H:2 * H]
        o = sig[:, 3 * H:4 * H]
        g = jnp.tanh(gates[:, 2 * H:3 * H])
        c_new = f * c + i * g
        h_new = o * jnp.tanh(c_new)
        return h_new, c_new

    # ---- fused 2-layer LSTM recurrence, fully unrolled (T static/small) ----
    for t in range(T):
        # layer 0: input projection precomputed -> single h @ Whh matmul.
        g0t = xproj[t * B:(t + 1) * B, :] + jnp.dot(
            h0.astype(jnp.bfloat16), whh0, preferred_element_type=jnp.float32)
        h0, c0 = gates_to_state(g0t, c0)
        # layer 1: one matmul on concat([h0_t, h1_{t-1}]).
        g1t = jnp.dot(
            jnp.concatenate([h0, h1], axis=1).astype(jnp.bfloat16), w1,
            preferred_element_type=jnp.float32) + b1
        h1, c1 = gates_to_state(g1t, c1)

    # ---- fused epilogue: bn1 over batch, Linear(H, O), sigmoid ----
    mu1 = jnp.mean(h1, axis=0, keepdims=True)
    var1 = jnp.mean((h1 - mu1) ** 2, axis=0, keepdims=True)
    hn = (h1 - mu1) * lax.rsqrt(var1 + EPS) * g1_ref[...] + be1_ref[...]
    logits = jnp.dot(hn.astype(jnp.bfloat16), wd_ref[...],
                     preferred_element_type=jnp.float32) + bd_ref[...]
    out_ref[...] = jax.nn.sigmoid(logits)


def _full_spec(shape):
    nd = len(shape)
    return pl.BlockSpec(shape, lambda i, _nd=nd: (0,) * _nd)


@jax.jit
def recurrent_net_forward(x, p):
    B, T, D = x.shape
    H = p["whh0"].shape[0]
    O = p["wd"].shape[1]

    # Wrapper-side layout plumbing (plain XLA, outside the kernel):
    #  * time-major flatten so the hoisted input projection is one
    #    well-shaped (T*B, D) matmul and per-step slices are tile aligned,
    #  * concat [Wih1; Whh1] once,
    #  * cast MXU weight operands to bf16 (f32 accumulation in-kernel).
    xt = jnp.transpose(x, (1, 0, 2)).reshape(T * B, D)
    wih0 = p["wih0"].astype(jnp.bfloat16)
    whh0 = p["whh0"].astype(jnp.bfloat16)
    w1 = jnp.concatenate([p["wih1"], p["whh1"]], axis=0).astype(jnp.bfloat16)
    wd = p["wd"].astype(jnp.bfloat16)

    args = (xt, p["g0"], p["be0"],
            wih0, whh0, p["b0"],
            w1, p["b1"],
            p["h0"], p["c0"],
            p["g1"], p["be1"],
            wd, p["bd"])
    in_specs = [_full_spec(a.shape) for a in args]

    # Everything (weights + whole projected sequence) is a few tens of KiB,
    # far below the VMEM ceiling on v5e/v6e/v7x; no scratch buffers needed.
    # TODO(synk): if T/B/H ever scale, switch to a time-blocked grid with
    # BlockSpec pipelining instead of keeping the full sequence resident.
    return pl.pallas_call(
        _recurrent_net_kernel,
        out_shape=jax.ShapeDtypeStruct((B, O), jnp.float32),
        grid_spec=pltpu.PrefetchScalarGridSpec(
            num_scalar_prefetch=0,
            grid=(1,),
            in_specs=in_specs,
            out_specs=_full_spec((B, O))),
        compiler_params=pltpu.CompilerParams(
            dimension_semantics=("arbitrary",)),
    )(*args)


def init_params(key, D, H, O, L, B):
    ks = jax.random.split(key, 12)
    k = 1.0 / np.sqrt(H)

    def u(kk, shape, bound):
        return jax.random.uniform(kk, shape, jnp.float32, -bound, bound)

    # LSTM weights pre-transposed to (in, 4H); biases combined b_ih + b_hh.
    wih0 = u(ks[0], (D, 4 * H), k)
    whh0 = u(ks[1], (H, 4 * H), k)
    b0 = u(ks[2], (1, 4 * H), k) + u(ks[3], (1, 4 * H), k)
    wih1 = u(ks[4], (H, 4 * H), k)
    whh1 = u(ks[5], (H, 4 * H), k)
    b1 = u(ks[6], (1, 4 * H), k) + u(ks[7], (1, 4 * H), k)
    # BatchNorm affine params (default init gamma=1, beta=0).
    g0, be0 = jnp.ones((1, D), jnp.float32), jnp.zeros((1, D), jnp.float32)
    g1, be1 = jnp.ones((1, H), jnp.float32), jnp.zeros((1, H), jnp.float32)
    # Dense layer.
    wd = u(ks[8], (H, O), k)
    bd = u(ks[9], (1, O), k)
    # init_hidden: xavier_uniform with tanh gain on (L, B, H) tensors.
    gain = 5.0 / 3.0
    bound_h = gain * np.sqrt(6.0 / (B * H + L * H))
    h0 = u(ks[10], (L, B, H), bound_h)
    c0 = u(ks[11], (L, B, H), bound_h)
    return dict(wih0=wih0, whh0=whh0, b0=b0, wih1=wih1, whh1=whh1, b1=b1,
                g0=g0, be0=be0, g1=g1, be1=be1, wd=wd, bd=bd, h0=h0, c0=c0)


def reference_forward(x, p):
    """Plain-JAX reference mirroring the PyTorch forward (training-mode BN)."""
    B, T, D = x.shape
    H = p["whh0"].shape[0]
    mu0 = jnp.mean(x, axis=(0, 1), keepdims=True)
    var0 = jnp.mean((x - mu0) ** 2, axis=(0, 1), keepdims=True)
    xn = (x - mu0) * lax.rsqrt(var0 + EPS) * p["g0"] + p["be0"]

    def run_layer(seq, wih, whh, b, h, c):
        hs = []
        for t in range(T):
            gates = (jnp.dot(seq[:, t, :], wih, precision=lax.Precision.HIGHEST)
                     + jnp.dot(h, whh, precision=lax.Precision.HIGHEST) + b)
            i = jax.nn.sigmoid(gates[:, :H])
            f = jax.nn.sigmoid(gates[:, H:2 * H])
            g = jnp.tanh(gates[:, 2 * H:3 * H])
            o = jax.nn.sigmoid(gates[:, 3 * H:])
            c = f * c + i * g
            h = o * jnp.tanh(c)
            hs.append(h)
        return jnp.stack(hs, axis=1), h

    seq1, _ = run_layer(xn, p["wih0"], p["whh0"], p["b0"], p["h0"][0], p["c0"][0])
    _, h_last = run_layer(seq1, p["wih1"], p["whh1"], p["b1"], p["h0"][1], p["c0"][1])
    mu1 = jnp.mean(h_last, axis=0, keepdims=True)
    var1 = jnp.mean((h_last - mu1) ** 2, axis=0, keepdims=True)
    hn = (h_last - mu1) * lax.rsqrt(var1 + EPS) * p["g1"] + p["be1"]
    return jax.nn.sigmoid(
        jnp.dot(hn, p["wd"], precision=lax.Precision.HIGHEST) + p["bd"])


if __name__ == "__main__":
    # Small shapes consistent with the module: input_dim=8, output_dim=4,
    # recurrent_layer='LSTM', num_rnn_layers=2, rnn_hidden_units=32, seq=8.
    # Batch of 8 so per-step slabs are full (8,128) tiles.
    B, T, D, H, O, L = 8, 8, 8, 32, 4, 2
    key = jax.random.PRNGKey(0)
    kx, kp = jax.random.split(key)
    x = jax.random.normal(kx, (B, T, D), jnp.float32)
    params = init_params(kp, D, H, O, L, B)

    out = jax.block_until_ready(recurrent_net_forward(x, params))
    ref = jax.block_until_ready(reference_forward(x, params))
    assert out.shape == (B, O), out.shape
    err = float(jnp.max(jnp.abs(out - ref)))
    # Kernel uses bf16 MXU operands (f32 accumulation); reference uses f32
    # HIGHEST precision, so allow a correspondingly looser tolerance.
    assert np.allclose(np.asarray(out), np.asarray(ref), atol=2e-2, rtol=2e-2), \
        f"mismatch, max abs err = {err}"
    # TODO(synk): dropout between stacked LSTM layers is unused (dropout_bool=0)
    # and BatchNorm running-statistics updates (module state) are not modeled.
    print("KERNEL_OK")
</pallas_src>

<mosaic_0001>
module attributes {stable_mosaic.version = 11 : i64} {
  func.func @_recurrent_net_kernel(%arg0: i32, %arg1: memref<64x8xf32, #tpu.memory_space<vmem>>, %arg2: memref<1x8xf32, #tpu.memory_space<vmem>>, %arg3: memref<1x8xf32, #tpu.memory_space<vmem>>, %arg4: memref<8x128xbf16, #tpu.memory_space<vmem>>, %arg5: memref<32x128xbf16, #tpu.memory_space<vmem>>, %arg6: memref<1x128xf32, #tpu.memory_space<vmem>>, %arg7: memref<64x128xbf16, #tpu.memory_space<vmem>>, %arg8: memref<1x128xf32, #tpu.memory_space<vmem>>, %arg9: memref<2x8x32xf32, #tpu.memory_space<vmem>>, %arg10: memref<2x8x32xf32, #tpu.memory_space<vmem>>, %arg11: memref<1x32xf32, #tpu.memory_space<vmem>>, %arg12: memref<1x32xf32, #tpu.memory_space<vmem>>, %arg13: memref<32x4xbf16, #tpu.memory_space<vmem>>, %arg14: memref<1x4xf32, #tpu.memory_space<vmem>>, %arg15: memref<8x4xf32, #tpu.memory_space<vmem>>) attributes {dimension_semantics = [#tpu.dimension_semantics<arbitrary>], iteration_bounds = array<i64: 1>, scalar_prefetch = 0 : i64, scratch_operands = 0 : i64, tpu.core_type = #tpu.core_type<tc>, window_params = [{pipeline_mode = #tpu.pipeline_mode<synchronous>, transform_indices = @transform_0, window_bounds = array<i64: 64, 8>}, {pipeline_mode = #tpu.pipeline_mode<synchronous>, transform_indices = @transform_1, window_bounds = array<i64: 1, 8>}, {pipeline_mode = #tpu.pipeline_mode<synchronous>, transform_indices = @transform_2, window_bounds = array<i64: 1, 8>}, {pipeline_mode = #tpu.pipeline_mode<synchronous>, transform_indices = @transform_3, window_bounds = array<i64: 8, 128>}, {pipeline_mode = #tpu.pipeline_mode<synchronous>, transform_indices = @transform_4, window_bounds = array<i64: 32, 128>}, {pipeline_mode = #tpu.pipeline_mode<synchronous>, transform_indices = @transform_5, window_bounds = array<i64: 1, 128>}, {pipeline_mode = #tpu.pipeline_mode<synchronous>, transform_indices = @transform_6, window_bounds = array<i64: 64, 128>}, {pipeline_mode = #tpu.pipeline_mode<synchronous>, transform_indices = @transform_7, window_bounds = array<i64: 1, 128>}, {pipeline_mode = #tpu.pipeline_mode<synchronous>, transform_indices = @transform_8, window_bounds = array<i64: 2, 8, 32>}, {pipeline_mode = #tpu.pipeline_mode<synchronous>, transform_indices = @transform_9, window_bounds = array<i64: 2, 8, 32>}, {pipeline_mode = #tpu.pipeline_mode<synchronous>, transform_indices = @transform_10, window_bounds = array<i64: 1, 32>}, {pipeline_mode = #tpu.pipeline_mode<synchronous>, transform_indices = @transform_11, window_bounds = array<i64: 1, 32>}, {pipeline_mode = #tpu.pipeline_mode<synchronous>, transform_indices = @transform_12, window_bounds = array<i64: 32, 4>}, {pipeline_mode = #tpu.pipeline_mode<synchronous>, transform_indices = @transform_13, window_bounds = array<i64: 1, 4>}, {pipeline_mode = #tpu.pipeline_mode<synchronous>, transform_indices = @transform_14, window_bounds = array<i64: 8, 4>}]} {
    %c0 = arith.constant 0 : index
    %c0_0 = arith.constant 0 : index
    %0 = vector.load %arg1[%c0, %c0_0] : memref<64x8xf32, #tpu.memory_space<vmem>>, vector<64x8xf32>
    %cst = arith.constant dense<0.000000e+00> : vector<8xf32>
    %1 = vector.multi_reduction <add>, %0, %cst [0] : vector<64x8xf32> to vector<8xf32>
    %2 = vector.shape_cast %1 : vector<8xf32> to vector<1x8xf32>
    %cst_1 = arith.constant 6.400000e+01 : f32
    %3 = vector.broadcast %cst_1 : f32 to vector<1x8xf32>
    %4 = arith.divf %2, %3 : vector<1x8xf32>
    %5 = vector.broadcast %4 : vector<1x8xf32> to vector<64x8xf32>
    %6 = arith.subf %0, %5 : vector<64x8xf32>
    %7 = arith.mulf %6, %6 : vector<64x8xf32>
    %cst_2 = arith.constant dense<0.000000e+00> : vector<8xf32>
    %8 = vector.multi_reduction <add>, %7, %cst_2 [0] : vector<64x8xf32> to vector<8xf32>
    %9 = vector.shape_cast %8 : vector<8xf32> to vector<1x8xf32>
    %cst_3 = arith.constant 6.400000e+01 : f32
    %10 = vector.broadcast %cst_3 : f32 to vector<1x8xf32>
    %11 = arith.divf %9, %10 : vector<1x8xf32>
    %12 = vector.broadcast %4 : vector<1x8xf32> to vector<64x8xf32>
    %13 = arith.subf %0, %12 : vector<64x8xf32>
    %cst_4 = arith.constant 9.99999974E-6 : f32
    %14 = vector.broadcast %cst_4 : f32 to vector<1x8xf32>
    %15 = arith.addf %11, %14 : vector<1x8xf32>
    %16 = math.rsqrt %15 : vector<1x8xf32>
    %17 = vector.broadcast %16 : vector<1x8xf32> to vector<64x8xf32>
    %18 = arith.mulf %13, %17 : vector<64x8xf32>
    %c0_5 = arith.constant 0 : index
    %c0_6 = arith.constant 0 : index
    %19 = vector.load %arg2[%c0_5, %c0_6] : memref<1x8xf32, #tpu.memory_space<vmem>>, vector<1x8xf32>
    %20 = vector.broadcast %19 : vector<1x8xf32> to vector<64x8xf32>
    %21 = arith.mulf %18, %20 : vector<64x8xf32>
    %c0_7 = arith.constant 0 : index
    %c0_8 = arith.constant 0 : index
    %22 = vector.load %arg3[%c0_7, %c0_8] : memref<1x8xf32, #tpu.memory_space<vmem>>, vector<1x8xf32>
    %23 = vector.broadcast %22 : vector<1x8xf32> to vector<64x8xf32>
    %24 = arith.addf %21, %23 : vector<64x8xf32>
    %25 = arith.truncf %24 : vector<64x8xf32> to vector<64x8xbf16>
    %c0_9 = arith.constant 0 : index
    %c0_10 = arith.constant 0 : index
    %26 = vector.load %arg4[%c0_9, %c0_10] : memref<8x128xbf16, #tpu.memory_space<vmem>>, vector<8x128xbf16>
    %cst_11 = arith.constant dense<0.000000e+00> : vector<64x128xf32>
    %27 = tpu.matmul %25, %26, %cst_11 {dimension_numbers = #tpu.dot_dimension_numbers<[1], [0], [0], [1], [0, 0, 1, 1], [], []>} : vector<64x8xbf16>, vector<8x128xbf16>, vector<64x128xf32> -> vector<64x128xf32>
    %c0_12 = arith.constant 0 : index
    %c0_13 = arith.constant 0 : index
    %28 = vector.load %arg6[%c0_12, %c0_13] : memref<1x128xf32, #tpu.memory_space<vmem>>, vector<1x128xf32>
    %29 = vector.broadcast %28 : vector<1x128xf32> to vector<64x128xf32>
    %30 = arith.addf %27, %29 : vector<64x128xf32>
    %c0_14 = arith.constant 0 : index
    %c0_15 = arith.constant 0 : index
    %31 = vector.load %arg5[%c0_14, %c0_15] : memref<32x128xbf16, #tpu.memory_space<vmem>>, vector<32x128xbf16>
    %c0_16 = arith.constant 0 : index
    %c0_17 = arith.constant 0 : index
    %32 = vector.load %arg7[%c0_16, %c0_17] : memref<64x128xbf16, #tpu.memory_space<vmem>>, vector<64x128xbf16>
    %c0_18 = arith.constant 0 : index
    %c0_19 = arith.constant 0 : index
    %33 = vector.load %arg8[%c0_18, %c0_19] : memref<1x128xf32, #tpu.memory_space<vmem>>, vector<1x128xf32>
    %34 = vector.shape_cast %33 : vector<1x128xf32> to vector<1x128xf32>
    %35 = vector.broadcast %34 : vector<1x128xf32> to vector<8x128xf32>
    %c0_20 = arith.constant 0 : index
    %c0_21 = arith.constant 0 : index
    %c0_22 = arith.constant 0 : index
    %36 = vector.load %arg9[%c0_20, %c0_21, %c0_22] : memref<2x8x32xf32, #tpu.memory_space<vmem>>, vector<1x8x32xf32>
    %37 = vector.shape_cast %36 : vector<1x8x32xf32> to vector<8x32xf32>
    %c0_23 = arith.constant 0 : index
    %c0_24 = arith.constant 0 : index
    %c0_25 = arith.constant 0 : index
    %38 = vector.load %arg10[%c0_23, %c0_24, %c0_25] : memref<2x8x32xf32, #tpu.memory_space<vmem>>, vector<1x8x32xf32>
    %39 = vector.shape_cast %38 : vector<1x8x32xf32> to vector<8x32xf32>
    %c1 = arith.constant 1 : index
    %c0_26 = arith.constant 0 : index
    %c0_27 = arith.constant 0 : index
    %40 = vector.load %arg9[%c1, %c0_26, %c0_27] : memref<2x8x32xf32, #tpu.memory_space<vmem>>, vector<1x8x32xf32>
    %41 = vector.shape_cast %40 : vector<1x8x32xf32> to vector<8x32xf32>
    %c1_28 = arith.constant 1 : index
    %c0_29 = arith.constant 0 : index
    %c0_30 = arith.constant 0 : index
    %42 = vector.load %arg10[%c1_28, %c0_29, %c0_30] : memref<2x8x32xf32, #tpu.memory_space<vmem>>, vector<1x8x32xf32>
    %43 = vector.shape_cast %42 : vector<1x8x32xf32> to vector<8x32xf32>
    %44 = vector.extract_strided_slice %30 {offsets = [0, 0], sizes = [8, 128], strides = [1, 1]} : vector<64x128xf32> to vector<8x128xf32>
    %45 = arith.truncf %37 : vector<8x32xf32> to vector<8x32xbf16>
    %cst_31 = arith.constant dense<0.000000e+00> : vector<8x128xf32>
    %46 = tpu.matmul %45, %31, %cst_31 {dimension_numbers = #tpu.dot_dimension_numbers<[1], [0], [0], [1], [0, 0, 1, 1], [], []>} : vector<8x32xbf16>, vector<32x128xbf16>, vector<8x128xf32> -> vector<8x128xf32>
    %47 = arith.addf %44, %46 : vector<8x128xf32>
    %48 = arith.negf %47 : vector<8x128xf32>
    %49 = math.exp %48 : vector<8x128xf32>
    %cst_32 = arith.constant 1.000000e+00 : f32
    %50 = vector.broadcast %cst_32 : f32 to vector<8x128xf32>
    %51 = arith.addf %50, %49 : vector<8x128xf32>
    %52 = arith.divf %50, %51 : vector<8x128xf32>
    %53 = vector.extract_strided_slice %52 {offsets = [0, 0], sizes = [8, 32], strides = [1, 1]} : vector<8x128xf32> to vector<8x32xf32>
    %54 = vector.extract_strided_slice %52 {offsets = [0, 32], sizes = [8, 32], strides = [1, 1]} : vector<8x128xf32> to vector<8x32xf32>
    %55 = vector.extract_strided_slice %52 {offsets = [0, 96], sizes = [8, 32], strides = [1, 1]} : vector<8x128xf32> to vector<8x32xf32>
    %56 = vector.extract_strided_slice %47 {offsets = [0, 64], sizes = [8, 32], strides = [1, 1]} : vector<8x128xf32> to vector<8x32xf32>
    %57 = math.tanh %56 : vector<8x32xf32>
    %58 = arith.mulf %54, %39 : vector<8x32xf32>
    %59 = arith.mulf %53, %57 : vector<8x32xf32>
    %60 = arith.addf %58, %59 : vector<8x32xf32>
    %61 = math.tanh %60 : vector<8x32xf32>
    %62 = arith.mulf %55, %61 : vector<8x32xf32>
    %63 = tpu.concatenate %62, %41 in 1 : vector<8x32xf32>, vector<8x32xf32> -> vector<8x64xf32>
    %64 = arith.truncf %63 : vector<8x64xf32> to vector<8x64xbf16>
    %cst_33 = arith.constant dense<0.000000e+00> : vector<8x128xf32>
    %65 = tpu.matmul %64, %32, %cst_33 {dimension_numbers = #tpu.dot_dimension_numbers<[1], [0], [0], [1], [0, 0, 1, 1], [], []>} : vector<8x64xbf16>, vector<64x128xbf16>, vector<8x128xf32> -> vector<8x128xf32>
    %66 = arith.addf %65, %35 : vector<8x128xf32>
    %67 = arith.negf %66 : vector<8x128xf32>
    %68 = math.exp %67 : vector<8x128xf32>
    %cst_34 = arith.constant 1.000000e+00 : f32
    %69 = vector.broadcast %cst_34 : f32 to vector<8x128xf32>
    %70 = arith.addf %69, %68 : vector<8x128xf32>
    %71 = arith.divf %69, %70 : vector<8x128xf32>
    %72 = vector.extract_strided_slice %71 {offsets = [0, 0], sizes = [8, 32], strides = [1, 1]} : vector<8x128xf32> to vector<8x32xf32>
    %73 = vector.extract_strided_slice %71 {offsets = [0, 32], sizes = [8, 32], strides = [1, 1]} : vector<8x128xf32> to vector<8x32xf32>
    %74 = vector.extract_strided_slice %71 {offsets = [0, 96], sizes = [8, 32], strides = [1, 1]} : vector<8x128xf32> to vector<8x32xf32>
    %75 = vector.extract_strided_slice %66 {offsets = [0, 64], sizes = [8, 32], strides = [1, 1]} : vector<8x128xf32> to vector<8x32xf32>
    %76 = math.tanh %75 : vector<8x32xf32>
    %77 = arith.mulf %73, %43 : vector<8x32xf32>
    %78 = arith.mulf %72, %76 : vector<8x32xf32>
    %79 = arith.addf %77, %78 : vector<8x32xf32>
    %80 = math.tanh %79 : vector<8x32xf32>
    %81 = arith.mulf %74, %80 : vector<8x32xf32>
    %82 = vector.extract_strided_slice %30 {offsets = [8, 0], sizes = [8, 128], strides = [1, 1]} : vector<64x128xf32> to vector<8x128xf32>
    %83 = arith.truncf %62 : vector<8x32xf32> to vector<8x32xbf16>
    %cst_35 = arith.constant dense<0.000000e+00> : vector<8x128xf32>
    %84 = tpu.matmul %83, %31, %cst_35 {dimension_numbers = #tpu.dot_dimension_numbers<[1], [0], [0], [1], [0, 0, 1, 1], [], []>} : vector<8x32xbf16>, vector<32x128xbf16>, vector<8x128xf32> -> vector<8x128xf32>
    %85 = arith.addf %82, %84 : vector<8x128xf32>
    %86 = arith.negf %85 : vector<8x128xf32>
    %87 = math.exp %86 : vector<8x128xf32>
    %cst_36 = arith.constant 1.000000e+00 : f32
    %88 = vector.broadcast %cst_36 : f32 to vector<8x128xf32>
    %89 = arith.addf %88, %87 : vector<8x128xf32>
    %90 = arith.divf %88, %89 : vector<8x128xf32>
    %91 = vector.extract_strided_slice %90 {offsets = [0, 0], sizes = [8, 32], strides = [1, 1]} : vector<8x128xf32> to vector<8x32xf32>
    %92 = vector.extract_strided_slice %90 {offsets = [0, 32], sizes = [8, 32], strides = [1, 1]} : vector<8x128xf32> to vector<8x32xf32>
    %93 = vector.extract_strided_slice %90 {offsets = [0, 96], sizes = [8, 32], strides = [1, 1]} : vector<8x128xf32> to vector<8x32xf32>
    %94 = vector.extract_strided_slice %85 {offsets = [0, 64], sizes = [8, 32], strides = [1, 1]} : vector<8x128xf32> to vector<8x32xf32>
    %95 = math.tanh %94 : vector<8x32xf32>
    %96 = arith.mulf %92, %60 : vector<8x32xf32>
    %97 = arith.mulf %91, %95 : vector<8x32xf32>
    %98 = arith.addf %96, %97 : vector<8x32xf32>
    %99 = math.tanh %98 : vector<8x32xf32>
    %100 = arith.mulf %93, %99 : vector<8x32xf32>
    %101 = tpu.concatenate %100, %81 in 1 : vector<8x32xf32>, vector<8x32xf32> -> vector<8x64xf32>
    %102 = arith.truncf %101 : vector<8x64xf32> to vector<8x64xbf16>
    %cst_37 = arith.constant dense<0.000000e+00> : vector<8x128xf32>
    %103 = tpu.matmul %102, %32, %cst_37 {dimension_numbers = #tpu.dot_dimension_numbers<[1], [0], [0], [1], [0, 0, 1, 1], [], []>} : vector<8x64xbf16>, vector<64x128xbf16>, vector<8x128xf32> -> vector<8x128xf32>
    %104 = arith.addf %103, %35 : vector<8x128xf32>
    %105 = arith.negf %104 : vector<8x128xf32>
    %106 = math.exp %105 : vector<8x128xf32>
    %cst_38 = arith.constant 1.000000e+00 : f32
    %107 = vector.broadcast %cst_38 : f32 to vector<8x128xf32>
    %108 = arith.addf %107, %106 : vector<8x128xf32>
    %109 = arith.divf %107, %108 : vector<8x128xf32>
    %110 = vector.extract_strided_slice %109 {offsets = [0, 0], sizes = [8, 32], strides = [1, 1]} : vector<8x128xf32> to vector<8x32xf32>
    %111 = vector.extract_strided_slice %109 {offsets = [0, 32], sizes = [8, 32], strides = [1, 1]} : vector<8x128xf32> to vector<8x32xf32>
    %112 = vector.extract_strided_slice %109 {offsets = [0, 96], sizes = [8, 32], strides = [1, 1]} : vector<8x128xf32> to vector<8x32xf32>
    %113 = vector.extract_strided_slice %104 {offsets = [0, 64], sizes = [8, 32], strides = [1, 1]} : vector<8x128xf32> to vector<8x32xf32>
    %114 = math.tanh %113 : vector<8x32xf32>
    %115 = arith.mulf %111, %79 : vector<8x32xf32>
    %116 = arith.mulf %110, %114 : vector<8x32xf32>
    %117 = arith.addf %115, %116 : vector<8x32xf32>
    %118 = math.tanh %117 : vector<8x32xf32>
    %119 = arith.mulf %112, %118 : vector<8x32xf32>
    %120 = vector.extract_strided_slice %30 {offsets = [16, 0], sizes = [8, 128], strides = [1, 1]} : vector<64x128xf32> to vector<8x128xf32>
    %121 = arith.truncf %100 : vector<8x32xf32> to vector<8x32xbf16>
    %cst_39 = arith.constant dense<0.000000e+00> : vector<8x128xf32>
    %122 = tpu.matmul %121, %31, %cst_39 {dimension_numbers = #tpu.dot_dimension_numbers<[1], [0], [0], [1], [0, 0, 1, 1], [], []>} : vector<8x32xbf16>, vector<32x128xbf16>, vector<8x128xf32> -> vector<8x128xf32>
    %123 = arith.addf %120, %122 : vector<8x128xf32>
    %124 = arith.negf %123 : vector<8x128xf32>
    %125 = math.exp %124 : vector<8x128xf32>
    %cst_40 = arith.constant 1.000000e+00 : f32
    %126 = vector.broadcast %cst_40 : f32 to vector<8x128xf32>
    %127 = arith.addf %126, %125 : vector<8x128xf32>
    %128 = arith.divf %126, %127 : vector<8x128xf32>
    %129 = vector.extract_strided_slice %128 {offsets = [0, 0], sizes = [8, 32], strides = [1, 1]} : vector<8x128xf32> to vector<8x32xf32>
    %130 = vector.extract_strided_slice %128 {offsets = [0, 32], sizes = [8, 32], strides = [1, 1]} : vector<8x128xf32> to vector<8x32xf32>
    %131 = vector.extract_strided_slice %128 {offsets = [0, 96], sizes = [8, 32], strides = [1, 1]} : vector<8x128xf32> to vector<8x32xf32>
    %132 = vector.extract_strided_slice %123 {offsets = [0, 64], sizes = [8, 32], strides = [1, 1]} : vector<8x128xf32> to vector<8x32xf32>
    %133 = math.tanh %132 : vector<8x32xf32>
    %134 = arith.mulf %130, %98 : vector<8x32xf32>
    %135 = arith.mulf %129, %133 : vector<8x32xf32>
    %136 = arith.addf %134, %135 : vector<8x32xf32>
    %137 = math.tanh %136 : vector<8x32xf32>
    %138 = arith.mulf %131, %137 : vector<8x32xf32>
    %139 = tpu.concatenate %138, %119 in 1 : vector<8x32xf32>, vector<8x32xf32> -> vector<8x64xf32>
    %140 = arith.truncf %139 : vector<8x64xf32> to vector<8x64xbf16>
    %cst_41 = arith.constant dense<0.000000e+00> : vector<8x128xf32>
    %141 = tpu.matmul %140, %32, %cst_41 {dimension_numbers = #tpu.dot_dimension_numbers<[1], [0], [0], [1], [0, 0, 1, 1], [], []>} : vector<8x64xbf16>, vector<64x128xbf16>, vector<8x128xf32> -> vector<8x128xf32>
    %142 = arith.addf %141, %35 : vector<8x128xf32>
    %143 = arith.negf %142 : vector<8x128xf32>
    %144 = math.exp %143 : vector<8x128xf32>
    %cst_42 = arith.constant 1.000000e+00 : f32
    %145 = vector.broadcast %cst_42 : f32 to vector<8x128xf32>
    %146 = arith.addf %145, %144 : vector<8x128xf32>
    %147 = arith.divf %145, %146 : vector<8x128xf32>
    %148 = vector.extract_strided_slice %147 {offsets = [0, 0], sizes = [8, 32], strides = [1, 1]} : vector<8x128xf32> to vector<8x32xf32>
    %149 = vector.extract_strided_slice %147 {offsets = [0, 32], sizes = [8, 32], strides = [1, 1]} : vector<8x128xf32> to vector<8x32xf32>
    %150 = vector.extract_strided_slice %147 {offsets = [0, 96], sizes = [8, 32], strides = [1, 1]} : vector<8x128xf32> to vector<8x32xf32>
    %151 = vector.extract_strided_slice %142 {offsets = [0, 64], sizes = [8, 32], strides = [1, 1]} : vector<8x128xf32> to vector<8x32xf32>
    %152 = math.tanh %151 : vector<8x32xf32>
    %153 = arith.mulf %149, %117 : vector<8x32xf32>
    %154 = arith.mulf %148, %152 : vector<8x32xf32>
    %155 = arith.addf %153, %154 : vector<8x32xf32>
    %156 = math.tanh %155 : vector<8x32xf32>
    %157 = arith.mulf %150, %156 : vector<8x32xf32>
    %158 = vector.extract_strided_slice %30 {offsets = [24, 0], sizes = [8, 128], strides = [1, 1]} : vector<64x128xf32> to vector<8x128xf32>
    %159 = arith.truncf %138 : vector<8x32xf32> to vector<8x32xbf16>
    %cst_43 = arith.constant dense<0.000000e+00> : vector<8x128xf32>
    %160 = tpu.matmul %159, %31, %cst_43 {dimension_numbers = #tpu.dot_dimension_numbers<[1], [0], [0], [1], [0, 0, 1, 1], [], []>} : vector<8x32xbf16>, vector<32x128xbf16>, vector<8x128xf32> -> vector<8x128xf32>
    %161 = arith.addf %158, %160 : vector<8x128xf32>
    %162 = arith.negf %161 : vector<8x128xf32>
    %163 = math.exp %162 : vector<8x128xf32>
    %cst_44 = arith.constant 1.000000e+00 : f32
    %164 = vector.broadcast %cst_44 : f32 to vector<8x128xf32>
    %165 = arith.addf %164, %163 : vector<8x128xf32>
    %166 = arith.divf %164, %165 : vector<8x128xf32>
    %167 = vector.extract_strided_slice %166 {offsets = [0, 0], sizes = [8, 32], strides = [1, 1]} : vector<8x128xf32> to vector<8x32xf32>
    %168 = vector.extract_strided_slice %166 {offsets = [0, 32], sizes = [8, 32], strides = [1, 1]} : vector<8x128xf32> to vector<8x32xf32>
    %169 = vector.extract_strided_slice %166 {offsets = [0, 96], sizes = [8, 32], strides = [1, 1]} : vector<8x128xf32> to vector<8x32xf32>
    %170 = vector.extract_strided_slice %161 {offsets = [0, 64], sizes = [8, 32], strides = [1, 1]} : vector<8x128xf32> to vector<8x32xf32>
    %171 = math.tanh %170 : vector<8x32xf32>
    %172 = arith.mulf %168, %136 : vector<8x32xf32>
    %173 = arith.mulf %167, %171 : vector<8x32xf32>
    %174 = arith.addf %172, %173 : vector<8x32xf32>
    %175 = math.tanh %174 : vector<8x32xf32>
    %176 = arith.mulf %169, %175 : vector<8x32xf32>
    %177 = tpu.concatenate %176, %157 in 1 : vector<8x32xf32>, vector<8x32xf32> -> vector<8x64xf32>
    %178 = arith.truncf %177 : vector<8x64xf32> to vector<8x64xbf16>
    %cst_45 = arith.constant dense<0.000000e+00> : vector<8x128xf32>
    %179 = tpu.matmul %178, %32, %cst_45 {dimension_numbers = #tpu.dot_dimension_numbers<[1], [0], [0], [1], [0, 0, 1, 1], [], []>} : vector<8x64xbf16>, vector<64x128xbf16>, vector<8x128xf32> -> vector<8x128xf32>
    %180 = arith.addf %179, %35 : vector<8x128xf32>
    %181 = arith.negf %180 : vector<8x128xf32>
    %182 = math.exp %181 : vector<8x128xf32>
    %cst_46 = arith.constant 1.000000e+00 : f32
    %183 = vector.broadcast %cst_46 : f32 to vector<8x128xf32>
    %184 = arith.addf %183, %182 : vector<8x128xf32>
    %185 = arith.divf %183, %184 : vector<8x128xf32>
    %186 = vector.extract_strided_slice %185 {offsets = [0, 0], sizes = [8, 32], strides = [1, 1]} : vector<8x128xf32> to vector<8x32xf32>
    %187 = vector.extract_strided_slice %185 {offsets = [0, 32], sizes = [8, 32], strides = [1, 1]} : vector<8x128xf32> to vector<8x32xf32>
    %188 = vector.extract_strided_slice %185 {offsets = [0, 96], sizes = [8, 32], strides = [1, 1]} : vector<8x128xf32> to vector<8x32xf32>
    %189 = vector.extract_strided_slice %180 {offsets = [0, 64], sizes = [8, 32], strides = [1, 1]} : vector<8x128xf32> to vector<8x32xf32>
    %190 = math.tanh %189 : vector<8x32xf32>
    %191 = arith.mulf %187, %155 : vector<8x32xf32>
    %192 = arith.mulf %186, %190 : vector<8x32xf32>
    %193 = arith.addf %191, %192 : vector<8x32xf32>
    %194 = math.tanh %193 : vector<8x32xf32>
    %195 = arith.mulf %188, %194 : vector<8x32xf32>
    %196 = vector.extract_strided_slice %30 {offsets = [32, 0], sizes = [8, 128], strides = [1, 1]} : vector<64x128xf32> to vector<8x128xf32>
    %197 = arith.truncf %176 : vector<8x32xf32> to vector<8x32xbf16>
    %cst_47 = arith.constant dense<0.000000e+00> : vector<8x128xf32>
    %198 = tpu.matmul %197, %31, %cst_47 {dimension_numbers = #tpu.dot_dimension_numbers<[1], [0], [0], [1], [0, 0, 1, 1], [], []>} : vector<8x32xbf16>, vector<32x128xbf16>, vector<8x128xf32> -> vector<8x128xf32>
    %199 = arith.addf %196, %198 : vector<8x128xf32>
    %200 = arith.negf %199 : vector<8x128xf32>
    %201 = math.exp %200 : vector<8x128xf32>
    %cst_48 = arith.constant 1.000000e+00 : f32
    %202 = vector.broadcast %cst_48 : f32 to vector<8x128xf32>
    %203 = arith.addf %202, %201 : vector<8x128xf32>
    %204 = arith.divf %202, %203 : vector<8x128xf32>
    %205 = vector.extract_strided_slice %204 {offsets = [0, 0], sizes = [8, 32], strides = [1, 1]} : vector<8x128xf32> to vector<8x32xf32>
    %206 = vector.extract_strided_slice %204 {offsets = [0, 32], sizes = [8, 32], strides = [1, 1]} : vector<8x128xf32> to vector<8x32xf32>
    %207 = vector.extract_strided_slice %204 {offsets = [0, 96], sizes = [8, 32], strides = [1, 1]} : vector<8x128xf32> to vector<8x32xf32>
    %208 = vector.extract_strided_slice %199 {offsets = [0, 64], sizes = [8, 32], strides = [1, 1]} : vector<8x128xf32> to vector<8x32xf32>
    %209 = math.tanh %208 : vector<8x32xf32>
    %210 = arith.mulf %206, %174 : vector<8x32xf32>
    %211 = arith.mulf %205, %209 : vector<8x32xf32>
    %212 = arith.addf %210, %211 : vector<8x32xf32>
    %213 = math.tanh %212 : vector<8x32xf32>
    %214 = arith.mulf %207, %213 : vector<8x32xf32>
    %215 = tpu.concatenate %214, %195 in 1 : vector<8x32xf32>, vector<8x32xf32> -> vector<8x64xf32>
    %216 = arith.truncf %215 : vector<8x64xf32> to vector<8x64xbf16>
    %cst_49 = arith.constant dense<0.000000e+00> : vector<8x128xf32>
    %217 = tpu.matmul %216, %32, %cst_49 {dimension_numbers = #tpu.dot_dimension_numbers<[1], [0], [0], [1], [0, 0, 1, 1], [], []>} : vector<8x64xbf16>, vector<64x128xbf16>, vector<8x128xf32> -> vector<8x128xf32>
    %218 = arith.addf %217, %35 : vector<8x128xf32>
    %219 = arith.negf %218 : vector<8x128xf32>
    %220 = math.exp %219 : vector<8x128xf32>
    %cst_50 = arith.constant 1.000000e+00 : f32
    %221 = vector.broadcast %cst_50 : f32 to vector<8x128xf32>
    %222 = arith.addf %221, %220 : vector<8x128xf32>
    %223 = arith.divf %221, %222 : vector<8x128xf32>
    %224 = vector.extract_strided_slice %223 {offsets = [0, 0], sizes = [8, 32], strides = [1, 1]} : vector<8x128xf32> to vector<8x32xf32>
    %225 = vector.extract_strided_slice %223 {offsets = [0, 32], sizes = [8, 32], strides = [1, 1]} : vector<8x128xf32> to vector<8x32xf32>
    %226 = vector.extract_strided_slice %223 {offsets = [0, 96], sizes = [8, 32], strides = [1, 1]} : vector<8x128xf32> to vector<8x32xf32>
    %227 = vector.extract_strided_slice %218 {offsets = [0, 64], sizes = [8, 32], strides = [1, 1]} : vector<8x128xf32> to vector<8x32xf32>
    %228 = math.tanh %227 : vector<8x32xf32>
    %229 = arith.mulf %225, %193 : vector<8x32xf32>
    %230 = arith.mulf %224, %228 : vector<8x32xf32>
    %231 = arith.addf %229, %230 : vector<8x32xf32>
    %232 = math.tanh %231 : vector<8x32xf32>
    %233 = arith.mulf %226, %232 : vector<8x32xf32>
    %234 = vector.extract_strided_slice %30 {offsets = [40, 0], sizes = [8, 128], strides = [1, 1]} : vector<64x128xf32> to vector<8x128xf32>
    %235 = arith.truncf %214 : vector<8x32xf32> to vector<8x32xbf16>
    %cst_51 = arith.constant dense<0.000000e+00> : vector<8x128xf32>
    %236 = tpu.matmul %235, %31, %cst_51 {dimension_numbers = #tpu.dot_dimension_numbers<[1], [0], [0], [1], [0, 0, 1, 1], [], []>} : vector<8x32xbf16>, vector<32x128xbf16>, vector<8x128xf32> -> vector<8x128xf32>
    %237 = arith.addf %234, %236 : vector<8x128xf32>
    %238 = arith.negf %237 : vector<8x128xf32>
    %239 = math.exp %238 : vector<8x128xf32>
    %cst_52 = arith.constant 1.000000e+00 : f32
    %240 = vector.broadcast %cst_52 : f32 to vector<8x128xf32>
    %241 = arith.addf %240, %239 : vector<8x128xf32>
    %242 = arith.divf %240, %241 : vector<8x128xf32>
    %243 = vector.extract_strided_slice %242 {offsets = [0, 0], sizes = [8, 32], strides = [1, 1]} : vector<8x128xf32> to vector<8x32xf32>
    %244 = vector.extract_strided_slice %242 {offsets = [0, 32], sizes = [8, 32], strides = [1, 1]} : vector<8x128xf32> to vector<8x32xf32>
    %245 = vector.extract_strided_slice %242 {offsets = [0, 96], sizes = [8, 32], strides = [1, 1]} : vector<8x128xf32> to vector<8x32xf32>
    %246 = vector.extract_strided_slice %237 {offsets = [0, 64], sizes = [8, 32], strides = [1, 1]} : vector<8x128xf32> to vector<8x32xf32>
    %247 = math.tanh %246 : vector<8x32xf32>
    %248 = arith.mulf %244, %212 : vector<8x32xf32>
    %249 = arith.mulf %243, %247 : vector<8x32xf32>
    %250 = arith.addf %248, %249 : vector<8x32xf32>
    %251 = math.tanh %250 : vector<8x32xf32>
    %252 = arith.mulf %245, %251 : vector<8x32xf32>
    %253 = tpu.concatenate %252, %233 in 1 : vector<8x32xf32>, vector<8x32xf32> -> vector<8x64xf32>
    %254 = arith.truncf %253 : vector<8x64xf32> to vector<8x64xbf16>
    %cst_53 = arith.constant dense<0.000000e+00> : vector<8x128xf32>
    %255 = tpu.matmul %254, %32, %cst_53 {dimension_numbers = #tpu.dot_dimension_numbers<[1], [0], [0], [1], [0, 0, 1, 1], [], []>} : vector<8x64xbf16>, vector<64x128xbf16>, vector<8x128xf32> -> vector<8x128xf32>
    %256 = arith.addf %255, %35 : vector<8x128xf32>
    %257 = arith.negf %256 : vector<8x128xf32>
    %258 = math.exp %257 : vector<8x128xf32>
    %cst_54 = arith.constant 1.000000e+00 : f32
    %259 = vector.broadcast %cst_54 : f32 to vector<8x128xf32>
    %260 = arith.addf %259, %258 : vector<8x128xf32>
    %261 = arith.divf %259, %260 : vector<8x128xf32>
    %262 = vector.extract_strided_slice %261 {offsets = [0, 0], sizes = [8, 32], strides = [1, 1]} : vector<8x128xf32> to vector<8x32xf32>
    %263 = vector.extract_strided_slice %261 {offsets = [0, 32], sizes = [8, 32], strides = [1, 1]} : vector<8x128xf32> to vector<8x32xf32>
    %264 = vector.extract_strided_slice %261 {offsets = [0, 96], sizes = [8, 32], strides = [1, 1]} : vector<8x128xf32> to vector<8x32xf32>
    %265 = vector.extract_strided_slice %256 {offsets = [0, 64], sizes = [8, 32], strides = [1, 1]} : vector<8x128xf32> to vector<8x32xf32>
    %266 = math.tanh %265 : vector<8x32xf32>
    %267 = arith.mulf %263, %231 : vector<8x32xf32>
    %268 = arith.mulf %262, %266 : vector<8x32xf32>
    %269 = arith.addf %267, %268 : vector<8x32xf32>
    %270 = math.tanh %269 : vector<8x32xf32>
    %271 = arith.mulf %264, %270 : vector<8x32xf32>
    %272 = vector.extract_strided_slice %30 {offsets = [48, 0], sizes = [8, 128], strides = [1, 1]} : vector<64x128xf32> to vector<8x128xf32>
    %273 = arith.truncf %252 : vector<8x32xf32> to vector<8x32xbf16>
    %cst_55 = arith.constant dense<0.000000e+00> : vector<8x128xf32>
    %274 = tpu.matmul %273, %31, %cst_55 {dimension_numbers = #tpu.dot_dimension_numbers<[1], [0], [0], [1], [0, 0, 1, 1], [], []>} : vector<8x32xbf16>, vector<32x128xbf16>, vector<8x128xf32> -> vector<8x128xf32>
    %275 = arith.addf %272, %274 : vector<8x128xf32>
    %276 = arith.negf %275 : vector<8x128xf32>
    %277 = math.exp %276 : vector<8x128xf32>
    %cst_56 = arith.constant 1.000000e+00 : f32
    %278 = vector.broadcast %cst_56 : f32 to vector<8x128xf32>
    %279 = arith.addf %278, %277 : vector<8x128xf32>
    %280 = arith.divf %278, %279 : vector<8x128xf32>
    %281 = vector.extract_strided_slice %280 {offsets = [0, 0], sizes = [8, 32], strides = [1, 1]} : vector<8x128xf32> to vector<8x32xf32>
    %282 = vector.extract_strided_slice %280 {offsets = [0, 32], sizes = [8, 32], strides = [1, 1]} : vector<8x128xf32> to vector<8x32xf32>
    %283 = vector.extract_strided_slice %280 {offsets = [0, 96], sizes = [8, 32], strides = [1, 1]} : vector<8x128xf32> to vector<8x32xf32>
    %284 = vector.extract_strided_slice %275 {offsets = [0, 64], sizes = [8, 32], strides = [1, 1]} : vector<8x128xf32> to vector<8x32xf32>
    %285 = math.tanh %284 : vector<8x32xf32>
    %286 = arith.mulf %282, %250 : vector<8x32xf32>
    %287 = arith.mulf %281, %285 : vector<8x32xf32>
    %288 = arith.addf %286, %287 : vector<8x32xf32>
    %289 = math.tanh %288 : vector<8x32xf32>
    %290 = arith.mulf %283, %289 : vector<8x32xf32>
    %291 = tpu.concatenate %290, %271 in 1 : vector<8x32xf32>, vector<8x32xf32> -> vector<8x64xf32>
    %292 = arith.truncf %291 : vector<8x64xf32> to vector<8x64xbf16>
    %cst_57 = arith.constant dense<0.000000e+00> : vector<8x128xf32>
    %293 = tpu.matmul %292, %32, %cst_57 {dimension_numbers = #tpu.dot_dimension_numbers<[1], [0], [0], [1], [0, 0, 1, 1], [], []>} : vector<8x64xbf16>, vector<64x128xbf16>, vector<8x128xf32> -> vector<8x128xf32>
    %294 = arith.addf %293, %35 : vector<8x128xf32>
    %295 = arith.negf %294 : vector<8x128xf32>
    %296 = math.exp %295 : vector<8x128xf32>
    %cst_58 = arith.constant 1.000000e+00 : f32
    %297 = vector.broadcast %cst_58 : f32 to vector<8x128xf32>
    %298 = arith.addf %297, %296 : vector<8x128xf32>
    %299 = arith.divf %297, %298 : vector<8x128xf32>
    %300 = vector.extract_strided_slice %299 {offsets = [0, 0], sizes = [8, 32], strides = [1, 1]} : vector<8x128xf32> to vector<8x32xf32>
    %301 = vector.extract_strided_slice %299 {offsets = [0, 32], sizes = [8, 32], strides = [1, 1]} : vector<8x128xf32> to vector<8x32xf32>
    %302 = vector.extract_strided_slice %299 {offsets = [0, 96], sizes = [8, 32], strides = [1, 1]} : vector<8x128xf32> to vector<8x32xf32>
    %303 = vector.extract_strided_slice %294 {offsets = [0, 64], sizes = [8, 32], strides = [1, 1]} : vector<8x128xf32> to vector<8x32xf32>
    %304 = math.tanh %303 : vector<8x32xf32>
    %305 = arith.mulf %301, %269 : vector<8x32xf32>
    %306 = arith.mulf %300, %304 : vector<8x32xf32>
    %307 = arith.addf %305, %306 : vector<8x32xf32>
    %308 = math.tanh %307 : vector<8x32xf32>
    %309 = arith.mulf %302, %308 : vector<8x32xf32>
    %310 = vector.extract_strided_slice %30 {offsets = [56, 0], sizes = [8, 128], strides = [1, 1]} : vector<64x128xf32> to vector<8x128xf32>
    %311 = arith.truncf %290 : vector<8x32xf32> to vector<8x32xbf16>
    %cst_59 = arith.constant dense<0.000000e+00> : vector<8x128xf32>
    %312 = tpu.matmul %311, %31, %cst_59 {dimension_numbers = #tpu.dot_dimension_numbers<[1], [0], [0], [1], [0, 0, 1, 1], [], []>} : vector<8x32xbf16>, vector<32x128xbf16>, vector<8x128xf32> -> vector<8x128xf32>
    %313 = arith.addf %310, %312 : vector<8x128xf32>
    %314 = arith.negf %313 : vector<8x128xf32>
    %315 = math.exp %314 : vector<8x128xf32>
    %cst_60 = arith.constant 1.000000e+00 : f32
    %316 = vector.broadcast %cst_60 : f32 to vector<8x128xf32>
    %317 = arith.addf %316, %315 : vector<8x128xf32>
    %318 = arith.divf %316, %317 : vector<8x128xf32>
    %319 = vector.extract_strided_slice %318 {offsets = [0, 0], sizes = [8, 32], strides = [1, 1]} : vector<8x128xf32> to vector<8x32xf32>
    %320 = vector.extract_strided_slice %318 {offsets = [0, 32], sizes = [8, 32], strides = [1, 1]} : vector<8x128xf32> to vector<8x32xf32>
    %321 = vector.extract_strided_slice %318 {offsets = [0, 96], sizes = [8, 32], strides = [1, 1]} : vector<8x128xf32> to vector<8x32xf32>
    %322 = vector.extract_strided_slice %313 {offsets = [0, 64], sizes = [8, 32], strides = [1, 1]} : vector<8x128xf32> to vector<8x32xf32>
    %323 = math.tanh %322 : vector<8x32xf32>
    %324 = arith.mulf %320, %288 : vector<8x32xf32>
    %325 = arith.mulf %319, %323 : vector<8x32xf32>
    %326 = arith.addf %324, %325 : vector<8x32xf32>
    %327 = math.tanh %326 : vector<8x32xf32>
    %328 = arith.mulf %321, %327 : vector<8x32xf32>
    %329 = tpu.concatenate %328, %309 in 1 : vector<8x32xf32>, vector<8x32xf32> -> vector<8x64xf32>
    %330 = arith.truncf %329 : vector<8x64xf32> to vector<8x64xbf16>
    %cst_61 = arith.constant dense<0.000000e+00> : vector<8x128xf32>
    %331 = tpu.matmul %330, %32, %cst_61 {dimension_numbers = #tpu.dot_dimension_numbers<[1], [0], [0], [1], [0, 0, 1, 1], [], []>} : vector<8x64xbf16>, vector<64x128xbf16>, vector<8x128xf32> -> vector<8x128xf32>
    %332 = arith.addf %331, %35 : vector<8x128xf32>
    %333 = arith.negf %332 : vector<8x128xf32>
    %334 = math.exp %333 : vector<8x128xf32>
    %cst_62 = arith.constant 1.000000e+00 : f32
    %335 = vector.broadcast %cst_62 : f32 to vector<8x128xf32>
    %336 = arith.addf %335, %334 : vector<8x128xf32>
    %337 = arith.divf %335, %336 : vector<8x128xf32>
    %338 = vector.extract_strided_slice %337 {offsets = [0, 0], sizes = [8, 32], strides = [1, 1]} : vector<8x128xf32> to vector<8x32xf32>
    %339 = vector.extract_strided_slice %337 {offsets = [0, 32], sizes = [8, 32], strides = [1, 1]} : vector<8x128xf32> to vector<8x32xf32>
    %340 = vector.extract_strided_slice %337 {offsets = [0, 96], sizes = [8, 32], strides = [1, 1]} : vector<8x128xf32> to vector<8x32xf32>
    %341 = vector.extract_strided_slice %332 {offsets = [0, 64], sizes = [8, 32], strides = [1, 1]} : vector<8x128xf32> to vector<8x32xf32>
    %342 = math.tanh %341 : vector<8x32xf32>
    %343 = arith.mulf %339, %307 : vector<8x32xf32>
    %344 = arith.mulf %338, %342 : vector<8x32xf32>
    %345 = arith.addf %343, %344 : vector<8x32xf32>
    %346 = math.tanh %345 : vector<8x32xf32>
    %347 = arith.mulf %340, %346 : vector<8x32xf32>
    %cst_63 = arith.constant dense<0.000000e+00> : vector<32xf32>
    %348 = vector.multi_reduction <add>, %347, %cst_63 [0] : vector<8x32xf32> to vector<32xf32>
    %349 = vector.shape_cast %348 : vector<32xf32> to vector<1x32xf32>
    %cst_64 = arith.constant 8.000000e+00 : f32
    %350 = vector.broadcast %cst_64 : f32 to vector<1x32xf32>
    %351 = arith.divf %349, %350 : vector<1x32xf32>
    %352 = vector.broadcast %351 : vector<1x32xf32> to vector<8x32xf32>
    %353 = arith.subf %347, %352 : vector<8x32xf32>
    %354 = arith.mulf %353, %353 : vector<8x32xf32>
    %cst_65 = arith.constant dense<0.000000e+00> : vector<32xf32>
    %355 = vector.multi_reduction <add>, %354, %cst_65 [0] : vector<8x32xf32> to vector<32xf32>
    %356 = vector.shape_cast %355 : vector<32xf32> to vector<1x32xf32>
    %cst_66 = arith.constant 8.000000e+00 : f32
    %357 = vector.broadcast %cst_66 : f32 to vector<1x32xf32>
    %358 = arith.divf %356, %357 : vector<1x32xf32>
    %359 = vector.broadcast %351 : vector<1x32xf32> to vector<8x32xf32>
    %360 = arith.subf %347, %359 : vector<8x32xf32>
    %cst_67 = arith.constant 9.99999974E-6 : f32
    %361 = vector.broadcast %cst_67 : f32 to vector<1x32xf32>
    %362 = arith.addf %358, %361 : vector<1x32xf32>
    %363 = math.rsqrt %362 : vector<1x32xf32>
    %364 = vector.broadcast %363 : vector<1x32xf32> to vector<8x32xf32>
    %365 = arith.mulf %360, %364 : vector<8x32xf32>
    %c0_68 = arith.constant 0 : index
    %c0_69 = arith.constant 0 : index
    %366 = vector.load %arg11[%c0_68, %c0_69] : memref<1x32xf32, #tpu.memory_space<vmem>>, vector<1x32xf32>
    %367 = vector.broadcast %366 : vector<1x32xf32> to vector<8x32xf32>
    %368 = arith.mulf %365, %367 : vector<8x32xf32>
    %c0_70 = arith.constant 0 : index
    %c0_71 = arith.constant 0 : index
    %369 = vector.load %arg12[%c0_70, %c0_71] : memref<1x32xf32, #tpu.memory_space<vmem>>, vector<1x32xf32>
    %370 = vector.broadcast %369 : vector<1x32xf32> to vector<8x32xf32>
    %371 = arith.addf %368, %370 : vector<8x32xf32>
    %372 = arith.truncf %371 : vector<8x32xf32> to vector<8x32xbf16>
    %c0_72 = arith.constant 0 : index
    %c0_73 = arith.constant 0 : index
    %373 = vector.load %arg13[%c0_72, %c0_73] : memref<32x4xbf16, #tpu.memory_space<vmem>>, vector<32x4xbf16>
    %cst_74 = arith.constant dense<0.000000e+00> : vector<8x4xf32>
    %374 = tpu.matmul %372, %373, %cst_74 {dimension_numbers = #tpu.dot_dimension_numbers<[1], [0], [0], [1], [0, 0, 1, 1], [], []>} : vector<8x32xbf16>, vector<32x4xbf16>, vector<8x4xf32> -> vector<8x4xf32>
    %c0_75 = arith.constant 0 : index
    %c0_76 = arith.constant 0 : index
    %375 = vector.load %arg14[%c0_75, %c0_76] : memref<1x4xf32, #tpu.memory_space<vmem>>, vector<1x4xf32>
    %376 = vector.broadcast %375 : vector<1x4xf32> to vector<8x4xf32>
    %377 = arith.addf %374, %376 : vector<8x4xf32>
    %378 = arith.negf %377 : vector<8x4xf32>
    %379 = math.exp %378 : vector<8x4xf32>
    %cst_77 = arith.constant 1.000000e+00 : f32
    %380 = vector.broadcast %cst_77 : f32 to vector<8x4xf32>
    %381 = arith.addf %380, %379 : vector<8x4xf32>
    %382 = arith.divf %380, %381 : vector<8x4xf32>
    %c0_78 = arith.constant 0 : index
    %c0_79 = arith.constant 0 : index
    %383 = vector.load %arg15[%c0_78, %c0_79] : memref<8x4xf32, #tpu.memory_space<vmem>>, vector<8x4xf32>
    tpu.vector_store %arg15[%c0_78, %c0_79], %382 {strides = array<i32>} : memref<8x4xf32, #tpu.memory_space<vmem>>, vector<8x4xf32>,
    return
  }
  func.func @transform_0(%arg0: i32) -> (i32, i32) {
    %c0_i32 = arith.constant 0 : i32
    %c0_i32_0 = arith.constant 0 : i32
    %c0_i32_1 = arith.constant 0 : i32
    return %c0_i32, %c0_i32_0 : i32, i32
  }
  func.func @transform_1(%arg0: i32) -> (i32, i32) {
    %c0_i32 = arith.constant 0 : i32
    %c0_i32_0 = arith.constant 0 : i32
    %c0_i32_1 = arith.constant 0 : i32
    return %c0_i32, %c0_i32_0 : i32, i32
  }
  func.func @transform_2(%arg0: i32) -> (i32, i32) {
    %c0_i32 = arith.constant 0 : i32
    %c0_i32_0 = arith.constant 0 : i32
    %c0_i32_1 = arith.constant 0 : i32
    return %c0_i32, %c0_i32_0 : i32, i32
  }
  func.func @transform_3(%arg0: i32) -> (i32, i32) {
    %c0_i32 = arith.constant 0 : i32
    %c0_i32_0 = arith.constant 0 : i32
    %c0_i32_1 = arith.constant 0 : i32
    return %c0_i32, %c0_i32_0 : i32, i32
  }
  func.func @transform_4(%arg0: i32) -> (i32, i32) {
    %c0_i32 = arith.constant 0 : i32
    %c0_i32_0 = arith.constant 0 : i32
    %c0_i32_1 = arith.constant 0 : i32
    return %c0_i32, %c0_i32_0 : i32, i32
  }
  func.func @transform_5(%arg0: i32) -> (i32, i32) {
    %c0_i32 = arith.constant 0 : i32
    %c0_i32_0 = arith.constant 0 : i32
    %c0_i32_1 = arith.constant 0 : i32
    return %c0_i32, %c0_i32_0 : i32, i32
  }
  func.func @transform_6(%arg0: i32) -> (i32, i32) {
    %c0_i32 = arith.constant 0 : i32
    %c0_i32_0 = arith.constant 0 : i32
    %c0_i32_1 = arith.constant 0 : i32
    return %c0_i32, %c0_i32_0 : i32, i32
  }
  func.func @transform_7(%arg0: i32) -> (i32, i32) {
    %c0_i32 = arith.constant 0 : i32
    %c0_i32_0 = arith.constant 0 : i32
    %c0_i32_1 = arith.constant 0 : i32
    return %c0_i32, %c0_i32_0 : i32, i32
  }
  func.func @transform_8(%arg0: i32) -> (i32, i32, i32) {
    %c0_i32 = arith.constant 0 : i32
    %c0_i32_0 = arith.constant 0 : i32
    %c0_i32_1 = arith.constant 0 : i32
    %c0_i32_2 = arith.constant 0 : i32
    return %c0_i32, %c0_i32_0, %c0_i32_1 : i32, i32, i32
  }
  func.func @transform_9(%arg0: i32) -> (i32, i32, i32) {
    %c0_i32 = arith.constant 0 : i32
    %c0_i32_0 = arith.constant 0 : i32
    %c0_i32_1 = arith.constant 0 : i32
    %c0_i32_2 = arith.constant 0 : i32
    return %c0_i32, %c0_i32_0, %c0_i32_1 : i32, i32, i32
  }
  func.func @transform_10(%arg0: i32) -> (i32, i32) {
    %c0_i32 = arith.constant 0 : i32
    %c0_i32_0 = arith.constant 0 : i32
    %c0_i32_1 = arith.constant 0 : i32
    return %c0_i32, %c0_i32_0 : i32, i32
  }
  func.func @transform_11(%arg0: i32) -> (i32, i32) {
    %c0_i32 = arith.constant 0 : i32
    %c0_i32_0 = arith.constant 0 : i32
    %c0_i32_1 = arith.constant 0 : i32
    return %c0_i32, %c0_i32_0 : i32, i32
  }
  func.func @transform_12(%arg0: i32) -> (i32, i32) {
    %c0_i32 = arith.constant 0 : i32
    %c0_i32_0 = arith.constant 0 : i32
    %c0_i32_1 = arith.constant 0 : i32
    return %c0_i32, %c0_i32_0 : i32, i32
  }
  func.func @transform_13(%arg0: i32) -> (i32, i32) {
    %c0_i32 = arith.constant 0 : i32
    %c0_i32_0 = arith.constant 0 : i32
    %c0_i32_1 = arith.constant 0 : i32
    return %c0_i32, %c0_i32_0 : i32, i32
  }
  func.func @transform_14(%arg0: i32) -> (i32, i32) {
    %c0_i32 = arith.constant 0 : i32
    %c0_i32_0 = arith.constant 0 : i32
    %c0_i32_1 = arith.constant 0 : i32
    return %c0_i32, %c0_i32_0 : i32, i32
  }
}

</mosaic_0001>

<bundles_post_ra>
// kernel: recurrent_net_forward.1
= control target key start
LH: loop header
LB: loop body
LE: loop exit
PB: predicated region body
PF: predicated region fallthrough
CT: control target
= control target key end

     0   :  { %vm182_vm0 = vcmask 1043456   ;;  %v2100_v0 = vmov 0.0   ;;  %vm56_vm1 = vcmask 64512   ;;  %vm2101_vm2 = vmmov 0   ;;  %s2103_s25 = smov 32   ;;  %s2104_s26 = smov 96   ;;  %s2666_s4 = inlined_call_operand.vmem [shape: bf16[32,128], index: 4, kind: input, shape index: {}]   ;;  %s2667_s3 = inlined_call_operand.vmem [shape: bf16[8,128], index: 3, kind: input, shape index: {}]   ;;  %s2668_s0 = inlined_call_operand.vmem [shape: f32[64,8], index: 0, kind: input, shape index: {}]   ;;  %s2669_s8 = inlined_call_operand.vmem [shape: f32[2,8,32], index: 8, kind: input, shape index: {}]   ;;  %s2670_s1 = inlined_call_operand.vmem [shape: f32[1,8], index: 1, kind: input, shape index: {}]   ;;  %s2671_s2 = inlined_call_operand.vmem [shape: f32[1,8], index: 2, kind: input, shape index: {}]   ;;  %s2672_s5 = inlined_call_operand.vmem [shape: f32[1,128], index: 5, kind: input, shape index: {}]   ;;  %s2673_s9 = inlined_call_operand.vmem [shape: f32[2,8,32], index: 9, kind: input, shape index: {}]   ;;  %s2674_s6 = inlined_call_operand.vmem [shape: bf16[64,128], index: 6, kind: input, shape index: {}]   ;;  %s2675_s7 = inlined_call_operand.vmem [shape: f32[1,128], index: 7, kind: input, shape index: {}]   ;;  %s2676_s10 = inlined_call_operand.vmem [shape: f32[1,32], index: 10, kind: input, shape index: {}]   ;;  %s2677_s11 = inlined_call_operand.vmem [shape: f32[1,32], index: 11, kind: input, shape index: {}]   ;;  %s2678_s12 = inlined_call_operand.vmem [shape: bf16[32,4], index: 12, kind: input, shape index: {}]   ;;  %s2679_s13 = inlined_call_operand.vmem [shape: f32[1,4], index: 13, kind: input, shape index: {}]   ;;  %s2680_s14 = inlined_call_operand.vmem [shape: f32[8,4], index: 14, kind: output, shape index: {}]  }
   0x1   :  { %1773 = vmatprep.subr.bf16.mxu1 %v2100_v0  ;;  %v2184_v1 = vld [vmem:[%s2666_s4] sm:$0xff]   ;;  %1777 = vmatprep.mubr.msk.bf16.mxu1 %vm2101_vm2, %v2100_v0  ;;  %v2195_v4 = vld [vmem:[%s2666_s4 + $0x8] sm:$0xff]   ;;  %v50_v7 = vld [vmem:[%s2668_s0 + $0x10] sm:$0xff]  ;;  %vm289_vm3 = vcmask 261120   ;;  %vm396_vm4 = vcmask 523264   ;;  %vm1511_vm5 = vcmask 1048320  }
   0x2   :  { %v162_v2 = vld [vmem:[%s2667_s3] sm:$0xf]  ;;  %1774 = vmatpush3.bf16.msra.mxu1 %v2184_v1  ;;  %v49_v6 = vld [vmem:[%s2668_s0 + $0x8] sm:$0xff]  ;;  %v51_v8 = vld [vmem:[%s2668_s0 + $0x18] sm:$0xff]  ;;  %v60_v13 = vsel %vm56_vm1, %v50_v7, 0.0  ;;  %s2102_s3 = smov 64  }
   0x3   :  { %1941 = vmatprep.subr.msk.bf16.mxu0 %vm182_vm0, %v162_v2  ;;  %v184_v3 = vsel %vm182_vm0, %v162_v2, 0  ;;  %v48_v5 = vld [vmem:[%s2668_s0] sm:$0xff]  ;;  %1775 = vmatprep.subr.bf16.mxu1 %v2100_v0  ;;  %v58_v10 = vsel %vm56_vm1, %v49_v6, 0.0  ;;  %v62_v14 = vsel %vm56_vm1, %v51_v8, 0.0  ;;  %v53_v16 = vld [vmem:[%s2668_s0 + $0x28] sm:$0xff]  ;;  %v54_v20 = vld [vmem:[%s2668_s0 + $0x30] sm:$0xff] }
   0x4   :  { %1764 = vmatpush3.bf16.msra.mxu0 %v184_v3  ;;  %v57_v9 = vsel %vm56_vm1, %v48_v5, 0.0  ;;  %v52_v11 = vld [vmem:[%s2668_s0 + $0x20] sm:$0xff]  ;;  %v66_v22 = vsel %vm56_vm1, %v53_v16, 0.0  ;;  %v55_v23 = vld [vmem:[%s2668_s0 + $0x38] sm:$0xff]  ;;  %v68_v25 = vsel %vm56_vm1, %v54_v20, 0.0  ;;  %vm1630_vm6 = vcmask 31744  }
   0x5   :  { %v59_v12 = vadd.f32 %v58_v10, %v57_v9  ;;  %1781 = vmatprep.subr.bf16.mxu0 %v2100_v0  ;;  %v270_v15 = vld [vmem:[%s2669_s8] sm:$0xff]  ;;  %v64_v19 = vsel %vm56_vm1, %v52_v11, 0.0  ;;  %v70_v27 = vsel %vm56_vm1, %v55_v23, 0.0 }
   0x6   :  { %1776 = vmatpush3.bf16.msra.mxu1 %v2195_v4  ;;  %v276_v18 = vpack.c.bf16 %v270_v15, %v270_v15 }
   0x7   :  { %v61_v17 = vadd.f32 %v60_v13, %v59_v12  ;;  %1793 = vmatprep.subr.bf16.mxu1 %v2100_v0 }
   0x9   :  { %v63_v21 = vadd.f32 %v62_v14, %v61_v17  ;;  %1778 = vmatmul.mubr.msk.bf16.vlgmr.msra.gmra.mrb[0].mxu1 %vm289_vm3, %v276_v18 }
   0xa   :  { %1794 = vmatpush3.bf16.msra.mxu1 %v2184_v1  ;;  %1797 = vmatprep.mubr.msk.bf16.mxu1 %vm2101_vm2, %v2100_v0 }
   0xb   :  { %v65_v24 = vadd.f32 %v64_v19, %v63_v21  ;;  %1795 = vmatprep.subr.bf16.mxu1 %v2100_v0  ;;  %v2273_v21 = vld [vmem:[%s2671_s2] ss:$0 sm:$0xff] }
   0xd   :  { %v67_v26 = vadd.f32 %v66_v22, %v65_v24 }
   0xe   :  { %1796 = vmatpush3.bf16.msra.mxu1 %v2195_v4 }
   0xf   :  { %v69_v28 = vadd.f32 %v68_v25, %v67_v26  ;;  %1801 = vmatprep.subr.bf16.mxu1 %v2100_v0 }
  0x11   :  { %v71_v29 = vadd.f32 %v70_v27, %v69_v28 }
  0x13   :  { %v72_v30 = vrot.slane %v71_v29, 4 }
  0x15   :  { %v73_v31 = vadd.f32 %v72_v30, %v71_v29 }
  0x17   :  { %v74_v32 = vrot.slane %v73_v31, 2 }
  0x19   :  { %v75_v33 = vadd.f32 %v74_v32, %v73_v31 }
  0x1b   :  { %v76_v34 = vrot.slane %v75_v33, 1 }
  0x1d   :  { %v77_v35 = vadd.f32 %v76_v34, %v75_v33 }
  0x1f   :  { %v79_v36 = vmul.f32 0.015625, %v77_v35 }
  0x21   :  { %v80_v37 = vsub.f32 %v48_v5, %v79_v36  ;;  %v81_v38 = vsub.f32 %v49_v6, %v79_v36  ;;  %v82_v39 = vsub.f32 %v50_v7, %v79_v36  ;;  %v83_v40 = vsub.f32 %v51_v8, %v79_v36 }
  0x22   :  { %v2243_v41 = vsub.f32 %v52_v11, %v79_v36  ;;  %v2245_v42 = vsub.f32 %v53_v16, %v79_v36  ;;  %v2247_v47 = vsub.f32 %v54_v20, %v79_v36  ;;  %v2254_v53 = vsub.f32 %v55_v23, %v79_v36  ;;  %v1636_v16 = vld [vmem:[%s2670_s1] ss:$0 sm:$0xff] }
  0x23   :  { %v88_v43 = vmul.f32 %v80_v37, %v80_v37  ;;  %v89_v44 = vmul.f32 %v81_v38, %v81_v38  ;;  %v90_v45 = vmul.f32 %v82_v39, %v82_v39  ;;  %v91_v46 = vmul.f32 %v83_v40, %v83_v40  ;;  %v2284_v36 = vld [vmem:[%s2672_s5] ss:$0 sm:$0xff] }
  0x24   :  { %v92_v48 = vmul.f32 %v2243_v41, %v2243_v41  ;;  %v93_v54 = vmul.f32 %v2245_v42, %v2245_v42  ;;  %v94_v57 = vmul.f32 %v2247_v47, %v2247_v47  ;;  %v95_v60 = vmul.f32 %v2254_v53, %v2254_v53 }
  0x25   :  { %v96_v49 = vsel %vm56_vm1, %v88_v43, 0.0  ;;  %v97_v50 = vsel %vm56_vm1, %v89_v44, 0.0  ;;  %v99_v51 = vsel %vm56_vm1, %v90_v45, 0.0  ;;  %v101_v55 = vsel %vm56_vm1, %v91_v46, 0.0  ;;  %v271_v46 = vld [vmem:[%s2673_s9] sm:$0xff] }
  0x26   :  { %v98_v52 = vadd.f32 %v97_v50, %v96_v49  ;;  %v103_v58 = vsel %vm56_vm1, %v92_v48, 0.0  ;;  %v105_v61 = vsel %vm56_vm1, %v93_v54, 0.0  ;;  %v107_v63 = vsel %vm56_vm1, %v94_v57, 0.0 }
  0x27   :  { %v109_v3 = vsel %vm56_vm1, %v95_v60, 0.0 }
  0x28   :  { %v100_v56 = vadd.f32 %v99_v51, %v98_v52 }
  0x2a   :  { %v102_v59 = vadd.f32 %v101_v55, %v100_v56 }
  0x2c   :  { %v104_v62 = vadd.f32 %v103_v58, %v102_v59 }
  0x2e   :  { %v106_v2 = vadd.f32 %v105_v61, %v104_v62 }
  0x30   :  { %v108_v5 = vadd.f32 %v107_v63, %v106_v2  ;;  %v2309_v63 = vld [vmem:[%s2674_s6] sm:$0xff]  }
  0x32   :  { %v110_v6 = vadd.f32 %v109_v3, %v108_v5 }
  0x34   :  { %v111_v7 = vrot.slane %v110_v6, 4 }
  0x36   :  { %v112_v8 = vadd.f32 %v111_v7, %v110_v6 }
  0x38   :  { %v113_v9 = vrot.slane %v112_v8, 2 }
  0x3a   :  { %v114_v10 = vadd.f32 %v113_v9, %v112_v8 }
  0x3c   :  { %v115_v11 = vrot.slane %v114_v10, 1 }
  0x3e   :  { %v116_v12 = vadd.f32 %v115_v11, %v114_v10  ;;  %v2326_v10 = vld [vmem:[%s2674_s6 + $0x10] sm:$0xff]  }
  0x40   :  { %v117_v13 = vmul.f32 0.015625, %v116_v12  ;;  %v2339_v12 = vld [vmem:[%s2674_s6 + $0x18] sm:$0xff]  }
  0x42   :  { %v118_v14 = vadd.f32 1e-05, %v117_v13  ;;  %v1644_v13 = vld [vmem:[%s2669_s8 + $0x8] sm:$0xff] }
  0x44   :  { %1960 = vrsqrt.f32 %v118_v14 }
  0x4e   :  { %v1961_v15 = vpop.eup %1960 }
  0x4f   :  { %v120_v17 = vmul.f32 %v1961_v15, %v80_v37  ;;  %v121_v18 = vmul.f32 %v1961_v15, %v81_v38  ;;  %v122_v19 = vmul.f32 %v1961_v15, %v82_v39  ;;  %v123_v20 = vmul.f32 %v1961_v15, %v83_v40 }
  0x50   :  { %v124_v59 = vmul.f32 %v1961_v15, %v2243_v41  ;;  %v125_v60 = vmul.f32 %v1961_v15, %v2245_v42  ;;  %v126_v61 = vmul.f32 %v1961_v15, %v2247_v47  ;;  %v127_v62 = vmul.f32 %v1961_v15, %v2254_v53  ;;  %v2315_v41 = vld [vmem:[%s2674_s6 + $0x8] sm:$0xff]  }
  0x51   :  { %v135_v22 = vmul.f32 %v1636_v16, %v120_v17  ;;  %v136_v23 = vmul.f32 %v1636_v16, %v121_v18  ;;  %v137_v24 = vmul.f32 %v1636_v16, %v122_v19  ;;  %v138_v25 = vmul.f32 %v1636_v16, %v123_v20 }
  0x52   :  { %v139_v2 = vmul.f32 %v1636_v16, %v124_v59  ;;  %v140_v3 = vmul.f32 %v1636_v16, %v125_v60  ;;  %v141_v5 = vmul.f32 %v1636_v16, %v126_v61  ;;  %v142_v6 = vmul.f32 %v1636_v16, %v127_v62 }
  0x53   :  { %v150_v26 = vadd.f32 %v2273_v21, %v135_v22  ;;  %v151_v27 = vadd.f32 %v2273_v21, %v136_v23  ;;  %v152_v28 = vadd.f32 %v2273_v21, %v137_v24  ;;  %v153_v29 = vadd.f32 %v2273_v21, %v138_v25 }
  0x54   :  { %v154_v42 = vadd.f32 %v2273_v21, %v139_v2  ;;  %v155_v47 = vadd.f32 %v2273_v21, %v140_v3  ;;  %v156_v53 = vadd.f32 %v2273_v21, %v141_v5  ;;  %v157_v7 = vadd.f32 %v2273_v21, %v142_v6 }
  0x55   :  { %v158_v30 = vpack.c.bf16 %v151_v27, %v150_v26  ;;  %v159_v31 = vpack.c.bf16 %v153_v29, %v152_v28 }
  0x56   :  { %v160_v8 = vpack.c.bf16 %v155_v47, %v154_v42  ;;  %v161_v9 = vpack.c.bf16 %v157_v7, %v156_v53 }
  0x57   :  { %1765 = vmatprep.mubr.msk.bf16.mxu0 %vm56_vm1, %v158_v30 }
  0x58   :  { %1766 = vmatmul.mubr.msk.bf16.vlgmr.msra.gmra.mrb[0].mxu0 %vm56_vm1, %v159_v31 }
  0x59   :  { %1782 = vmatpush3.bf16.msra.mxu0 %v2309_v63  ;;  %1769 = vmatprep.mubr.msk.bf16.mxu0 %vm56_vm1, %v160_v8 }
  0x5a   :  { %1783 = vmatprep.subr.bf16.mxu0 %v2100_v0 }
  0x5d   :  { %1784 = vmatpush3.bf16.msra.mxu0 %v2315_v41 }
  0x5e   :  { %1785 = vmatprep.subr.bf16.mxu0 %v2100_v0 }
  0x60   :  { %1770 = vmatmul.mubr.msk.bf16.gmra.mrb[4].mxu0 %vm56_vm1, %v161_v9 }
  0x61   :  { %1789 = vmatprep.mubr.msk.bf16.mxu0 %vm2101_vm2, %v2100_v0  ;;  %1786 = vmatpush3.bf16.msra.mxu0 %v2326_v10 }
  0x62   :  { %1787 = vmatprep.subr.bf16.mxu0 %v2100_v0 }
  0x65   :  { %1788 = vmatpush3.bf16.msra.mxu0 %v2339_v12 }
  0x66   :  { %1813 = vmatprep.subr.bf16.mxu0 %v2100_v0 }
  0xdc   :  { %v327_v32 = vpop.f32.mrb[0].mxu1 }
  0xdd   :  { %v1779_v33 = vpop.f32.mrb[1].mxu1 }
  0xde   :  { %v330_v34 = vpop.f32.mrb[2].mxu1 }
  0xdf   :  { %v1780_v35 = vpop.f32.mrb[3].mxu1  ;;  %v2380_v34 = vld [vmem:[%s2675_s7] ss:$0 sm:$0xff] }
 0x12b   :  { %v2286_v37 = vpop.f32.mrb[0].mxu0 }
 0x12c   :  { %v220_v38 = vpop.f32.mrb[1].mxu0 }
 0x12d   :  { %v221_v39 = vadd.f32 %v2284_v36, %v220_v38  ;;  %v2289_v40 = vpop.f32.mrb[2].mxu0 }
 0x12e   :  { %v2291_v43 = vpop.f32.mrb[3].mxu0 }
 0x12f   :  { %v333_v44 = vadd.f32 %v327_v32, %v221_v39  ;;  %v224_v28 = vadd.f32 %v2284_v36, %v2291_v43 }
 0x131   :  { %1962 = vtanh.f32 %v333_v44  ;;  %v1649_v48 = vmul.f32 -1.442695, %v333_v44 }
 0x133   :  { %1964 = vpow2.f32 %v1649_v48  ;;  %v2348_v18 = vpop.f32.mrb[4].mxu0  ;;  %v1645_v48 = vld [vmem:[%s2673_s9 + $0x8] sm:$0xff] }
 0x134   :  { %v2350_v19 = vpop.f32.mrb[5].mxu0 }
 0x135   :  { %v2352_v20 = vpop.f32.mrb[6].mxu0 }
 0x136   :  { %v2354_v21 = vpop.f32.mrb[7].mxu0 }
 0x13b   :  { %v1963_v45 = vpop.eup %1962 }
 0x13c   :  { %347 = vrot.lane.b32.xlu0 %v1963_v45, %s2102_s3 }
 0x13d   :  { %v1965_v49 = vpop.eup %1964 }
 0x13e   :  { %v337_v50 = vadd.f32 1.0, %v1965_v49 }
 0x140   :  { %342 = vrot.lane.b32.xlu0 %v271_v46, %s2103_s25  ;;  %1966 = vrcp.f32 %v337_v50 }
 0x14a   :  { %v1967_v51 = vpop.eup %1966 }
 0x1ae   :  { %v348_v52 = vpop.permute.xlu0 %347 }
 0x1af   :  { %v350_v54 = vmul.f32 %v1967_v51, %v348_v52 }
 0x1b1   :  { %352 = vrot.lane.b32.xlu1 %v350_v54, %s2103_s25 }
 0x1b2   :  { %v343_v55 = vpop.permute.xlu0 %342 }
 0x1b3   :  { %v345_v56 = vmul.f32 %v1967_v51, %v343_v55 }
 0x223   :  { %v353_v57 = vpop.permute.xlu1 %352 }
 0x224   :  { %v2299_v58 = vadd.f32 %v353_v57, %v345_v56 }
 0x226   :  { %1968 = vtanh.f32 %v2299_v58 }
 0x230   :  { %v1969_v11 = vpop.eup %1968 }
 0x231   :  { %358 = vrot.lane.b32.xlu1 %v1969_v11, %s2102_s3 }
 0x2a3   :  { %v359_v14 = vpop.permute.xlu1 %358 }
 0x2a4   :  { %v361_v15 = vmul.f32 %v1967_v51, %v359_v14 }
 0x2a6   :  { %v1947_v16 = vpack.i.bf16 %v1644_v13, %v361_v15  ;;  %v468_v17 = vpack.c.bf16 %v361_v15, %v361_v15 }
 0x2a8   :  { %1948 = vrot.lane.b32.xlu0 %v1947_v16, %s2103_s25  ;;  %470 = vrot.lane.b32.xlu1 %v468_v17, %s2103_s25 }
 0x31a   :  { %v1949_v22 = vpop.permute.xlu0 %1948  ;;  %v471_v23 = vpop.permute.xlu1 %470 }
 0x31b   :  { %v1951_v24 = vunpack.i.h.bf16 %v1949_v22  ;;  %v1950_v25 = vunpack.i.l.bf16 %v1949_v22  ;;  %1798 = vmatmul.mubr.msk.bf16.vlgmr.msra.gmra.mrb[4].mxu1 %vm289_vm3, %v471_v23 }
 0x31c   :  { %1802 = vmatpush3.bf16.msra.mxu1 %v2309_v63  ;;  %1809 = vmatprep.mubr.msk.bf16.mxu1 %vm2101_vm2, %v2100_v0 }
 0x31d   :  { %v370_v26 = vsel %vm289_vm3, %v1950_v25, %v1951_v24  ;;  %1803 = vmatprep.subr.bf16.mxu1 %v2100_v0  ;;  %v229_v24 = vadd.f32 %v2286_v37, %v2284_v36 }
 0x31e   :  { %v371_v27 = vpack.c.bf16 %v370_v26, %v370_v26 }
 0x320   :  { %1790 = vmatmul.mubr.msk.bf16.vlgmr.msra.gmra.mrb[8].mxu0 %vm396_vm4, %v371_v27  ;;  %1804 = vmatpush3.bf16.msra.mxu1 %v2315_v41 }
 0x321   :  { %1814 = vmatpush3.bf16.msra.mxu0 %v2184_v1  ;;  %1805 = vmatprep.subr.bf16.mxu1 %v2100_v0 }
 0x322   :  { %1815 = vmatprep.subr.bf16.mxu0 %v2100_v0  ;;  %1817 = vmatprep.mubr.msk.bf16.mxu0 %vm2101_vm2, %v2100_v0 }
 0x324   :  { %1806 = vmatpush3.bf16.msra.mxu1 %v2326_v10 }
 0x325   :  { %1816 = vmatpush3.bf16.msra.mxu0 %v2195_v4  ;;  %1807 = vmatprep.subr.bf16.mxu1 %v2100_v0 }
 0x326   :  { %1821 = vmatprep.subr.bf16.mxu0 %v2100_v0 }
 0x328   :  { %1808 = vmatpush3.bf16.msra.mxu1 %v2339_v12 }
 0x329   :  { %1833 = vmatprep.subr.bf16.mxu1 %v2100_v0 }
 0x3ee   :  { %v509_v29 = vpop.f32.mrb[4].mxu1 }
 0x3ef   :  { %v515_v30 = vadd.f32 %v509_v29, %v224_v28  ;;  %v1799_v31 = vpop.f32.mrb[5].mxu1 }
 0x3f0   :  { %v512_v32 = vpop.f32.mrb[6].mxu1 }
 0x3f1   :  { %1970 = vtanh.f32 %v515_v30  ;;  %v1800_v33 = vpop.f32.mrb[7].mxu1  ;;  %v1657_v49 = vmul.f32 -1.442695, %v515_v30 }
 0x3f3   :  { %v434_v35 = vpop.f32.mrb[8].mxu0 }
 0x3f4   :  { %v435_v38 = vadd.f32 %v2380_v34, %v434_v35  ;;  %v1791_v39 = vpop.f32.mrb[9].mxu0 }
 0x3f5   :  { %v437_v44 = vpop.f32.mrb[10].mxu0 }
 0x3f6   :  { %1972 = vtanh.f32 %v435_v38  ;;  %v1792_v45 = vpop.f32.mrb[11].mxu0  ;;  %v1655_v50 = vmul.f32 -1.442695, %v435_v38 }
 0x3f7   :  { %1974 = vpow2.f32 %v1657_v49 }
 0x3f8   :  { %1976 = vpow2.f32 %v1655_v50 }
 0x3fb   :  { %v1971_v46 = vpop.eup %1970 }
 0x3fc   :  { %525 = vrot.lane.b32.xlu1 %v1971_v46, %s2102_s3 }
 0x400   :  { %v1973_v43 = vpop.eup %1972 }
 0x401   :  { %453 = vrot.lane.b32.xlu0 %v1973_v43, %s2102_s3  ;;  %v1975_v51 = vpop.eup %1974 }
 0x402   :  { %v519_v52 = vadd.f32 1.0, %v1975_v51  ;;  %v1977_v54 = vpop.eup %1976 }
 0x403   :  { %v443_v55 = vadd.f32 1.0, %v1977_v54 }
 0x404   :  { %1978 = vrcp.f32 %v519_v52 }
 0x405   :  { %448 = vrot.lane.b32.xlu0 %v1645_v48, %s2103_s25  ;;  %1980 = vrcp.f32 %v443_v55 }
 0x40e   :  { %v1979_v56 = vpop.eup %1978 }
 0x40f   :  { %v1981_v60 = vpop.eup %1980  ;;  %v523_v3 = vmul.f32 %v1979_v56, %v2299_v58 }
 0x46e   :  { %v526_v57 = vpop.permute.xlu1 %525 }
 0x46f   :  { %v528_v59 = vmul.f32 %v1979_v56, %v526_v57 }
 0x471   :  { %530 = vrot.lane.b32.xlu0 %v528_v59, %s2103_s25 }
 0x473   :  { %v454_v61 = vpop.permute.xlu0 %453 }
 0x474   :  { %v456_v62 = vmul.f32 %v1981_v60, %v454_v61 }
 0x476   :  { %458 = vrot.lane.b32.xlu1 %v456_v62, %s2103_s25 }
 0x477   :  { %v449_v2 = vpop.permute.xlu0 %448 }
 0x478   :  { %v451_v42 = vmul.f32 %v1981_v60, %v449_v2 }
 0x4e3   :  { %v531_v5 = vpop.permute.xlu0 %530 }
 0x4e4   :  { %v2392_v6 = vadd.f32 %v531_v5, %v523_v3 }
 0x4e6   :  { %1982 = vtanh.f32 %v2392_v6 }
 0x4e8   :  { %v459_v47 = vpop.permute.xlu1 %458 }
 0x4e9   :  { %v2395_v53 = vadd.f32 %v459_v47, %v451_v42 }
 0x4eb   :  { %1984 = vtanh.f32 %v2395_v53 }
 0x4f0   :  { %v1983_v7 = vpop.eup %1982 }
 0x4f1   :  { %536 = vrot.lane.b32.xlu0 %v1983_v7, %s2102_s3 }
 0x4f5   :  { %v1985_v8 = vpop.eup %1984 }
 0x4f6   :  { %464 = vrot.lane.b32.xlu1 %v1985_v8, %s2102_s3 }
 0x563   :  { %v537_v9 = vpop.permute.xlu0 %536 }
 0x564   :  { %v539_v11 = vmul.f32 %v1979_v56, %v537_v9 }
 0x566   :  { %541 = vrot.lane.b32.xlu1 %v539_v11, %s2103_s25  ;;  %v617_v58 = vpack.c.bf16 %v539_v11, %v539_v11 }
 0x568   :  { %v465_v13 = vpop.permute.xlu1 %464 }
 0x569   :  { %v467_v14 = vmul.f32 %v1981_v60, %v465_v13  ;;  %v232_v13 = vadd.f32 %v2289_v40, %v2284_v36 }
 0x56a   :  { %619 = vrot.lane.b32.xlu1 %v617_v58, %s2103_s25 }
 0x56b   :  { %545 = vrot.lane.b32.xlu0 %v467_v14, %s2102_s3 }
 0x5d8   :  { %v542_v15 = vpop.permute.xlu1 %541 }
 0x5dc   :  { %v620_v16 = vpop.permute.xlu1 %619 }
 0x5dd   :  { %1818 = vmatmul.mubr.msk.bf16.vlgmr.msra.gmra.mrb[12].mxu0 %vm289_vm3, %v620_v16  ;;  %v546_v17 = vpop.permute.xlu0 %545 }
 0x5de   :  { %v548_v22 = vsel %vm289_vm3, %v542_v15, %v546_v17  ;;  %1822 = vmatpush3.bf16.msra.mxu0 %v2309_v63  ;;  %1829 = vmatprep.mubr.msk.bf16.mxu0 %vm2101_vm2, %v2100_v0 }
 0x5df   :  { %v549_v23 = vpack.c.bf16 %v548_v22, %v548_v22  ;;  %1823 = vmatprep.subr.bf16.mxu0 %v2100_v0 }
 0x5e1   :  { %1810 = vmatmul.mubr.msk.bf16.vlgmr.msra.gmra.mrb[8].mxu1 %vm396_vm4, %v549_v23 }
 0x5e2   :  { %1824 = vmatpush3.bf16.msra.mxu0 %v2315_v41  ;;  %1834 = vmatpush3.bf16.msra.mxu1 %v2184_v1 }
 0x5e3   :  { %1825 = vmatprep.subr.bf16.mxu0 %v2100_v0  ;;  %1835 = vmatprep.subr.bf16.mxu1 %v2100_v0 }
 0x5e4   :  { %1837 = vmatprep.mubr.msk.bf16.mxu1 %vm2101_vm2, %v2100_v0 }
 0x5e6   :  { %1826 = vmatpush3.bf16.msra.mxu0 %v2326_v10  ;;  %1836 = vmatpush3.bf16.msra.mxu1 %v2195_v4 }
 0x5e7   :  { %1827 = vmatprep.subr.bf16.mxu0 %v2100_v0  ;;  %1841 = vmatprep.subr.bf16.mxu1 %v2100_v0 }
 0x5ea   :  { %1828 = vmatpush3.bf16.msra.mxu0 %v2339_v12 }
 0x5eb   :  { %1853 = vmatprep.subr.bf16.mxu0 %v2100_v0 }
 0x6b0   :  { %v658_v25 = vpop.f32.mrb[12].mxu0 }
 0x6b1   :  { %v664_v26 = vadd.f32 %v658_v25, %v229_v24  ;;  %v1819_v27 = vpop.f32.mrb[13].mxu0 }
 0x6b2   :  { %v661_v28 = vpop.f32.mrb[14].mxu0 }
 0x6b3   :  { %1986 = vtanh.f32 %v664_v26  ;;  %v1820_v29 = vpop.f32.mrb[15].mxu0  ;;  %v1661_v37 = vmul.f32 -1.442695, %v664_v26 }
 0x6b4   :  { %v587_v30 = vpop.f32.mrb[8].mxu1 }
 0x6b5   :  { %v588_v31 = vadd.f32 %v2380_v34, %v587_v30  ;;  %v1811_v32 = vpop.f32.mrb[9].mxu1 }
 0x6b6   :  { %v590_v33 = vpop.f32.mrb[10].mxu1 }
 0x6b7   :  { %1988 = vtanh.f32 %v588_v31  ;;  %v1812_v35 = vpop.f32.mrb[11].mxu1  ;;  %v1659_v44 = vmul.f32 -1.442695, %v588_v31 }
 0x6b8   :  { %1990 = vpow2.f32 %v1661_v37 }
 0x6b9   :  { %1992 = vpow2.f32 %v1659_v44 }
 0x6bd   :  { %v1987_v38 = vpop.eup %1986 }
 0x6be   :  { %674 = vrot.lane.b32.xlu1 %v1987_v38, %s2102_s3 }
 0x6c1   :  { %v1989_v39 = vpop.eup %1988 }
 0x6c2   :  { %602 = vrot.lane.b32.xlu0 %v1989_v39, %s2102_s3  ;;  %v1991_v45 = vpop.eup %1990 }
 0x6c3   :  { %v668_v46 = vadd.f32 1.0, %v1991_v45  ;;  %v1993_v43 = vpop.eup %1992 }
 0x6c4   :  { %v596_v48 = vadd.f32 1.0, %v1993_v43 }
 0x6c5   :  { %1994 = vrcp.f32 %v668_v46 }
 0x6c6   :  { %1996 = vrcp.f32 %v596_v48 }
 0x6cf   :  { %v1995_v49 = vpop.eup %1994 }
 0x6d0   :  { %v1997_v52 = vpop.eup %1996  ;;  %v672_v56 = vmul.f32 %v1995_v49, %v2392_v6 }
 0x6d1   :  { %v600_v60 = vmul.f32 %v1997_v52, %v2395_v53 }
 0x730   :  { %v675_v50 = vpop.permute.xlu1 %674 }
 0x731   :  { %v677_v51 = vmul.f32 %v1995_v49, %v675_v50 }
 0x733   :  { %679 = vrot.lane.b32.xlu1 %v677_v51, %s2103_s25 }
 0x734   :  { %v603_v54 = vpop.permute.xlu0 %602 }
 0x735   :  { %v605_v55 = vmul.f32 %v1997_v52, %v603_v54 }
 0x737   :  { %607 = vrot.lane.b32.xlu0 %v605_v55, %s2103_s25 }
 0x7a5   :  { %v680_v57 = vpop.permute.xlu1 %679 }
 0x7a6   :  { %v2430_v59 = vadd.f32 %v680_v57, %v672_v56 }
 0x7a8   :  { %1998 = vtanh.f32 %v2430_v59 }
 0x7a9   :  { %v608_v61 = vpop.permute.xlu0 %607 }
 0x7aa   :  { %v2434_v62 = vadd.f32 %v608_v61, %v600_v60 }
 0x7ac   :  { %2000 = vtanh.f32 %v2434_v62 }
 0x7b2   :  { %v1999_v2 = vpop.eup %1998 }
 0x7b3   :  { %685 = vrot.lane.b32.xlu1 %v1999_v2, %s2102_s3 }
 0x7b6   :  { %v2001_v3 = vpop.eup %2000 }
 0x7b7   :  { %613 = vrot.lane.b32.xlu0 %v2001_v3, %s2102_s3 }
 0x825   :  { %v686_v5 = vpop.permute.xlu1 %685 }
 0x826   :  { %v688_v6 = vmul.f32 %v1995_v49, %v686_v5 }
 0x828   :  { %690 = vrot.lane.b32.xlu0 %v688_v6, %s2103_s25  ;;  %v766_v47 = vpack.c.bf16 %v688_v6, %v688_v6 }
 0x829   :  { %v614_v42 = vpop.permute.xlu0 %613 }
 0x82a   :  { %v616_v7 = vmul.f32 %v1997_v52, %v614_v42 }
 0x82c   :  { %768 = vrot.lane.b32.xlu0 %v766_v47, %s2103_s25  ;;  %694 = vrot.lane.b32.xlu1 %v616_v7, %s2102_s3 }
 0x89a   :  { %v691_v53 = vpop.permute.xlu0 %690 }
 0x89e   :  { %v695_v8 = vpop.permute.xlu1 %694  ;;  %v769_v9 = vpop.permute.xlu0 %768 }
 0x89f   :  { %v697_v11 = vsel %vm289_vm3, %v691_v53, %v695_v8  ;;  %1838 = vmatmul.mubr.msk.bf16.vlgmr.msra.gmra.mrb[12].mxu1 %vm289_vm3, %v769_v9 }
 0x8a0   :  { %v698_v58 = vpack.c.bf16 %v697_v11, %v697_v11  ;;  %1842 = vmatpush3.bf16.msra.mxu1 %v2309_v63  ;;  %1849 = vmatprep.mubr.msk.bf16.mxu1 %vm2101_vm2, %v2100_v0 }
 0x8a1   :  { %1843 = vmatprep.subr.bf16.mxu1 %v2100_v0 }
 0x8a2   :  { %1830 = vmatmul.mubr.msk.bf16.vlgmr.msra.gmra.mrb[16].mxu0 %vm396_vm4, %v698_v58 }
 0x8a3   :  { %1854 = vmatpush3.bf16.msra.mxu0 %v2184_v1  ;;  %1857 = vmatprep.mubr.msk.bf16.mxu0 %vm2101_vm2, %v2100_v0 }
 0x8a4   :  { %1844 = vmatpush3.bf16.msra.mxu1 %v2315_v41  ;;  %1855 = vmatprep.subr.bf16.mxu0 %v2100_v0 }
 0x8a5   :  { %1845 = vmatprep.subr.bf16.mxu1 %v2100_v0 }
 0x8a7   :  { %1856 = vmatpush3.bf16.msra.mxu0 %v2195_v4 }
 0x8a8   :  { %1846 = vmatpush3.bf16.msra.mxu1 %v2326_v10  ;;  %1861 = vmatprep.subr.bf16.mxu0 %v2100_v0 }
 0x8a9   :  { %1847 = vmatprep.subr.bf16.mxu1 %v2100_v0 }
 0x8ac   :  { %1848 = vmatpush3.bf16.msra.mxu1 %v2339_v12 }
 0x8ad   :  { %1873 = vmatprep.subr.bf16.mxu1 %v2100_v0 }
 0x972   :  { %v807_v14 = vpop.f32.mrb[12].mxu1 }
 0x973   :  { %v813_v15 = vadd.f32 %v807_v14, %v232_v13  ;;  %v1839_v16 = vpop.f32.mrb[13].mxu1 }
 0x974   :  { %v810_v17 = vpop.f32.mrb[14].mxu1 }
 0x975   :  { %2002 = vtanh.f32 %v813_v15  ;;  %v736_v22 = vpop.f32.mrb[16].mxu0  ;;  %v1840_v23 = vpop.f32.mrb[15].mxu1  ;;  %v1665_v40 = vmul.f32 -1.442695, %v813_v15 }
 0x976   :  { %v737_v24 = vadd.f32 %v2380_v34, %v736_v22  ;;  %v1831_v25 = vpop.f32.mrb[17].mxu0 }
 0x977   :  { %v739_v26 = vpop.f32.mrb[18].mxu0 }
 0x978   :  { %2004 = vtanh.f32 %v737_v24  ;;  %v1832_v27 = vpop.f32.mrb[19].mxu0  ;;  %v1663_v30 = vmul.f32 -1.442695, %v737_v24 }
 0x979   :  { %2006 = vpow2.f32 %v1665_v40 }
 0x97a   :  { %2008 = vpow2.f32 %v1663_v30 }
 0x97f   :  { %v2003_v28 = vpop.eup %2002 }
 0x980   :  { %823 = vrot.lane.b32.xlu0 %v2003_v28, %s2102_s3 }
 0x982   :  { %v2005_v29 = vpop.eup %2004 }
 0x983   :  { %751 = vrot.lane.b32.xlu1 %v2005_v29, %s2102_s3  ;;  %v2007_v31 = vpop.eup %2006 }
 0x984   :  { %v2009_v32 = vpop.eup %2008  ;;  %v817_v33 = vadd.f32 1.0, %v2007_v31 }
 0x985   :  { %v745_v35 = vadd.f32 1.0, %v2009_v32 }
 0x986   :  { %2010 = vrcp.f32 %v817_v33 }
 0x987   :  { %2012 = vrcp.f32 %v745_v35 }
 0x990   :  { %v2011_v38 = vpop.eup %2010 }
 0x991   :  { %v2013_v44 = vpop.eup %2012  ;;  %v821_v43 = vmul.f32 %v2011_v38, %v2430_v59 }
 0x992   :  { %v749_v50 = vmul.f32 %v2013_v44, %v2434_v62 }
 0x9f2   :  { %v824_v39 = vpop.permute.xlu0 %823 }
 0x9f3   :  { %v826_v37 = vmul.f32 %v2011_v38, %v824_v39 }
 0x9f5   :  { %v752_v45 = vpop.permute.xlu1 %751  ;;  %828 = vrot.lane.b32.xlu0 %v826_v37, %s2103_s25 }
 0x9f6   :  { %v754_v46 = vmul.f32 %v2013_v44, %v752_v45 }
 0x9f8   :  { %756 = vrot.lane.b32.xlu1 %v754_v46, %s2103_s25 }
 0xa67   :  { %v829_v48 = vpop.permute.xlu0 %828 }
 0xa68   :  { %v2469_v49 = vadd.f32 %v829_v48, %v821_v43 }
 0xa6a   :  { %2014 = vtanh.f32 %v2469_v49  ;;  %v757_v51 = vpop.permute.xlu1 %756 }
 0xa6b   :  { %v2473_v52 = vadd.f32 %v757_v51, %v749_v50 }
 0xa6d   :  { %2016 = vtanh.f32 %v2473_v52 }
 0xa74   :  { %v2015_v54 = vpop.eup %2014 }
 0xa75   :  { %834 = vrot.lane.b32.xlu0 %v2015_v54, %s2102_s3 }
 0xa77   :  { %v2017_v55 = vpop.eup %2016 }
 0xa78   :  { %762 = vrot.lane.b32.xlu1 %v2017_v55, %s2102_s3  ;;  %v2530_v55 = vld [vmem:[%s2666_s4] sm:$0xff]  }
 0xae7   :  { %v835_v56 = vpop.permute.xlu0 %834 }
 0xae8   :  { %v837_v57 = vmul.f32 %v2011_v38, %v835_v56  ;;  %v2541_v56 = vld [vmem:[%s2666_s4 + $0x8] sm:$0xff]  }
 0xaea   :  { %v763_v59 = vpop.permute.xlu1 %762  ;;  %839 = vrot.lane.b32.xlu1 %v837_v57, %s2103_s25  ;;  %v915_v61 = vpack.c.bf16 %v837_v57, %v837_v57  ;;  %v240_v57 = vadd.f32 %v2284_v36, %v2354_v21 }
 0xaeb   :  { %v765_v60 = vmul.f32 %v2013_v44, %v763_v59 }
 0xaed   :  { %843 = vrot.lane.b32.xlu0 %v765_v60, %s2102_s3 }
 0xaee   :  { %917 = vrot.lane.b32.xlu1 %v915_v61, %s2103_s25 }
 0xb5c   :  { %v840_v62 = vpop.permute.xlu1 %839 }
 0xb5f   :  { %v844_v2 = vpop.permute.xlu0 %843 }
 0xb60   :  { %v846_v3 = vsel %vm289_vm3, %v840_v62, %v844_v2  ;;  %v918_v5 = vpop.permute.xlu1 %917 }
 0xb61   :  { %v847_v6 = vpack.c.bf16 %v846_v3, %v846_v3  ;;  %1858 = vmatmul.mubr.msk.bf16.vlgmr.msra.gmra.mrb[20].mxu0 %vm289_vm3, %v918_v5 }
 0xb62   :  { %1862 = vmatpush3.bf16.msra.mxu0 %v2309_v63  ;;  %1869 = vmatprep.mubr.msk.bf16.mxu0 %vm2101_vm2, %v2100_v0 }
 0xb63   :  { %1850 = vmatmul.mubr.msk.bf16.vlgmr.msra.gmra.mrb[16].mxu1 %vm396_vm4, %v847_v6  ;;  %1863 = vmatprep.subr.bf16.mxu0 %v2100_v0 }
 0xb64   :  { %1874 = vmatpush3.bf16.msra.mxu1 %v2184_v1  ;;  %1877 = vmatprep.mubr.msk.bf16.mxu1 %vm2101_vm2, %v2100_v0  ;;  %v237_v1 = vadd.f32 %v2284_v36, %v2350_v19 }
 0xb65   :  { %1875 = vmatprep.subr.bf16.mxu1 %v2100_v0 }
 0xb66   :  { %1864 = vmatpush3.bf16.msra.mxu0 %v2315_v41 }
 0xb67   :  { %1865 = vmatprep.subr.bf16.mxu0 %v2100_v0 }
 0xb68   :  { %1876 = vmatpush3.bf16.msra.mxu1 %v2195_v4 }
 0xb69   :  { %1881 = vmatprep.subr.bf16.mxu1 %v2100_v0 }
 0xb6a   :  { %1866 = vmatpush3.bf16.msra.mxu0 %v2326_v10 }
 0xb6b   :  { %1867 = vmatprep.subr.bf16.mxu0 %v2100_v0 }
 0xb6e   :  { %1868 = vmatpush3.bf16.msra.mxu0 %v2339_v12 }
 0xb6f   :  { %1893 = vmatprep.subr.bf16.mxu0 %v2100_v0 }
 0xc34   :  { %v956_v42 = vpop.f32.mrb[20].mxu0 }
 0xc35   :  { %v962_v47 = vadd.f32 %v956_v42, %v237_v1  ;;  %v1859_v7 = vpop.f32.mrb[21].mxu0 }
 0xc36   :  { %v885_v53 = vpop.f32.mrb[16].mxu1  ;;  %v959_v8 = vpop.f32.mrb[22].mxu0 }
 0xc37   :  { %2018 = vtanh.f32 %v962_v47  ;;  %v886_v4 = vadd.f32 %v2380_v34, %v885_v53  ;;  %v1851_v9 = vpop.f32.mrb[17].mxu1  ;;  %v1860_v11 = vpop.f32.mrb[23].mxu0  ;;  %v1669_v19 = vmul.f32 -1.442695, %v962_v47 }
 0xc38   :  { %v888_v58 = vpop.f32.mrb[18].mxu1 }
 0xc39   :  { %v1852_v13 = vpop.f32.mrb[19].mxu1  ;;  %2020 = vtanh.f32 %v886_v4  ;;  %v1667_v16 = vmul.f32 -1.442695, %v886_v4 }
 0xc3a   :  { %2022 = vpow2.f32 %v1669_v19 }
 0xc3b   :  { %2024 = vpow2.f32 %v1667_v16 }
 0xc41   :  { %v2019_v14 = vpop.eup %2018 }
 0xc42   :  { %972 = vrot.lane.b32.xlu1 %v2019_v14, %s2102_s3 }
 0xc43   :  { %v2021_v15 = vpop.eup %2020 }
 0xc44   :  { %900 = vrot.lane.b32.xlu0 %v2021_v15, %s2102_s3  ;;  %v2023_v17 = vpop.eup %2022 }
 0xc45   :  { %v2025_v22 = vpop.eup %2024  ;;  %v966_v23 = vadd.f32 1.0, %v2023_v17 }
 0xc46   :  { %v894_v24 = vadd.f32 1.0, %v2025_v22 }
 0xc47   :  { %2026 = vrcp.f32 %v966_v23 }
 0xc48   :  { %2028 = vrcp.f32 %v894_v24 }
 0xc51   :  { %v2027_v25 = vpop.eup %2026 }
 0xc52   :  { %v2029_v28 = vpop.eup %2028  ;;  %v970_v30 = vmul.f32 %v2027_v25, %v2469_v49 }
 0xc53   :  { %v898_v33 = vmul.f32 %v2029_v28, %v2473_v52 }
 0xcb4   :  { %v973_v26 = vpop.permute.xlu1 %972 }
 0xcb5   :  { %v975_v27 = vmul.f32 %v2027_v25, %v973_v26 }
 0xcb6   :  { %v901_v29 = vpop.permute.xlu0 %900 }
 0xcb7   :  { %977 = vrot.lane.b32.xlu1 %v975_v27, %s2103_s25  ;;  %v903_v40 = vmul.f32 %v2029_v28, %v901_v29 }
 0xcb9   :  { %905 = vrot.lane.b32.xlu0 %v903_v40, %s2103_s25 }
 0xd29   :  { %v978_v31 = vpop.permute.xlu1 %977 }
 0xd2a   :  { %v2508_v32 = vadd.f32 %v978_v31, %v970_v30 }
 0xd2b   :  { %v906_v35 = vpop.permute.xlu0 %905 }
 0xd2c   :  { %2030 = vtanh.f32 %v2508_v32  ;;  %v2512_v38 = vadd.f32 %v906_v35, %v898_v33 }
 0xd2e   :  { %2032 = vtanh.f32 %v2512_v38 }
 0xd36   :  { %v2031_v39 = vpop.eup %2030 }
 0xd37   :  { %983 = vrot.lane.b32.xlu1 %v2031_v39, %s2102_s3 }
 0xd38   :  { %v2033_v37 = vpop.eup %2032 }
 0xd39   :  { %911 = vrot.lane.b32.xlu0 %v2033_v37, %s2102_s3 }
 0xda9   :  { %v984_v44 = vpop.permute.xlu1 %983 }
 0xdaa   :  { %v986_v45 = vmul.f32 %v2027_v25, %v984_v44 }
 0xdab   :  { %v912_v46 = vpop.permute.xlu0 %911 }
 0xdac   :  { %988 = vrot.lane.b32.xlu0 %v986_v45, %s2103_s25  ;;  %v914_v43 = vmul.f32 %v2029_v28, %v912_v46  ;;  %v1064_v48 = vpack.c.bf16 %v986_v45, %v986_v45 }
 0xdae   :  { %992 = vrot.lane.b32.xlu1 %v914_v43, %s2102_s3 }
 0xdb0   :  { %1066 = vrot.lane.b32.xlu0 %v1064_v48, %s2103_s25 }
 0xe1e   :  { %v989_v49 = vpop.permute.xlu0 %988 }
 0xe20   :  { %v993_v50 = vpop.permute.xlu1 %992 }
 0xe21   :  { %v995_v51 = vsel %vm289_vm3, %v989_v49, %v993_v50 }
 0xe22   :  { %v1067_v52 = vpop.permute.xlu0 %1066  ;;  %v996_v54 = vpack.c.bf16 %v995_v51, %v995_v51 }
 0xe23   :  { %1878 = vmatmul.mubr.msk.bf16.vlgmr.msra.gmra.mrb[20].mxu1 %vm289_vm3, %v1067_v52 }
 0xe24   :  { %1882 = vmatpush3.bf16.msra.mxu1 %v2309_v63  ;;  %1889 = vmatprep.mubr.msk.bf16.mxu1 %vm2101_vm2, %v2100_v0 }
 0xe25   :  { %1870 = vmatmul.mubr.msk.bf16.vlgmr.msra.gmra.mrb[24].mxu0 %vm396_vm4, %v996_v54  ;;  %1883 = vmatprep.subr.bf16.mxu1 %v2100_v0 }
 0xe26   :  { %1894 = vmatpush3.bf16.msra.mxu0 %v2530_v55  ;;  %1897 = vmatprep.mubr.msk.bf16.mxu0 %vm2101_vm2, %v2100_v0 }
 0xe27   :  { %1895 = vmatprep.subr.bf16.mxu0 %v2100_v0 }
 0xe28   :  { %1884 = vmatpush3.bf16.msra.mxu1 %v2315_v41 }
 0xe29   :  { %1885 = vmatprep.subr.bf16.mxu1 %v2100_v0 }
 0xe2a   :  { %1896 = vmatpush3.bf16.msra.mxu0 %v2541_v56 }
 0xe2b   :  { %1901 = vmatprep.subr.bf16.mxu0 %v2100_v0 }
 0xe2c   :  { %1886 = vmatpush3.bf16.msra.mxu1 %v2326_v10 }
 0xe2d   :  { %1887 = vmatprep.subr.bf16.mxu1 %v2100_v0 }
 0xe30   :  { %1888 = vmatpush3.bf16.msra.mxu1 %v2339_v12 }
 0xe31   :  { %1913 = vmatprep.subr.bf16.mxu1 %v2100_v0 }
 0xef6   :  { %v1105_v59 = vpop.f32.mrb[20].mxu1 }
 0xef7   :  { %v1111_v60 = vadd.f32 %v1105_v59, %v240_v57  ;;  %v1879_v61 = vpop.f32.mrb[21].mxu1 }
 0xef8   :  { %v1034_v62 = vpop.f32.mrb[24].mxu0  ;;  %v1108_v2 = vpop.f32.mrb[22].mxu1 }
 0xef9   :  { %2034 = vtanh.f32 %v1111_v60  ;;  %v1035_v3 = vadd.f32 %v2380_v34, %v1034_v62  ;;  %v1871_v5 = vpop.f32.mrb[25].mxu0  ;;  %v1880_v6 = vpop.f32.mrb[23].mxu1  ;;  %v1673_v21 = vmul.f32 -1.442695, %v1111_v60 }
 0xefa   :  { %v1037_v1 = vpop.f32.mrb[26].mxu0 }
 0xefb   :  { %v1872_v42 = vpop.f32.mrb[27].mxu0  ;;  %2036 = vtanh.f32 %v1035_v3  ;;  %v1671_v53 = vmul.f32 -1.442695, %v1035_v3 }
 0xefc   :  { %2038 = vpow2.f32 %v1673_v21 }
 0xefd   :  { %2040 = vpow2.f32 %v1671_v53 }
 0xf03   :  { %v2035_v47 = vpop.eup %2034 }
 0xf04   :  { %1121 = vrot.lane.b32.xlu0 %v2035_v47, %s2102_s3 }
 0xf05   :  { %v2037_v7 = vpop.eup %2036 }
 0xf06   :  { %1049 = vrot.lane.b32.xlu1 %v2037_v7, %s2102_s3  ;;  %v2039_v8 = vpop.eup %2038 }
 0xf07   :  { %v2041_v4 = vpop.eup %2040  ;;  %v1115_v9 = vadd.f32 1.0, %v2039_v8 }
 0xf08   :  { %v1043_v11 = vadd.f32 1.0, %v2041_v4 }
 0xf09   :  { %2042 = vrcp.f32 %v1115_v9 }
 0xf0a   :  { %2044 = vrcp.f32 %v1043_v11 }
 0xf13   :  { %v2043_v58 = vpop.eup %2042 }
 0xf14   :  { %v2045_v15 = vpop.eup %2044  ;;  %v1119_v17 = vmul.f32 %v2043_v58, %v2508_v32 }
 0xf15   :  { %v1047_v24 = vmul.f32 %v2045_v15, %v2512_v38 }
 0xf76   :  { %v1122_v13 = vpop.permute.xlu0 %1121 }
 0xf77   :  { %v1124_v14 = vmul.f32 %v2043_v58, %v1122_v13 }
 0xf78   :  { %v1050_v19 = vpop.permute.xlu1 %1049 }
 0xf79   :  { %1126 = vrot.lane.b32.xlu0 %v1124_v14, %s2103_s25  ;;  %v1052_v16 = vmul.f32 %v2045_v15, %v1050_v19 }
 0xf7b   :  { %1054 = vrot.lane.b32.xlu1 %v1052_v16, %s2103_s25 }
 0xfeb   :  { %v1127_v22 = vpop.permute.xlu0 %1126 }
 0xfec   :  { %v2557_v23 = vadd.f32 %v1127_v22, %v1119_v17 }
 0xfed   :  { %v1055_v25 = vpop.permute.xlu1 %1054 }
 0xfee   :  { %2046 = vtanh.f32 %v2557_v23  ;;  %v2561_v26 = vadd.f32 %v1055_v25, %v1047_v24  ;;  %v2098_v24 = vld [vmem:[%s2674_s6] sm:$0xff]  }
 0xfef   :  { %v2099_v25 = vld [vmem:[%s2672_s5] ss:$0 sm:$0xff] }
 0xff0   :  { %2048 = vtanh.f32 %v2561_v26 }
 0xff8   :  { %v2047_v27 = vpop.eup %2046 }
 0xff9   :  { %1132 = vrot.lane.b32.xlu0 %v2047_v27, %s2102_s3 }
 0xffa   :  { %v2049_v28 = vpop.eup %2048 }
 0xffb   :  { %1060 = vrot.lane.b32.xlu1 %v2049_v28, %s2102_s3 }
0x106b   :  { %v1133_v29 = vpop.permute.xlu0 %1132 }
0x106c   :  { %v1135_v40 = vmul.f32 %v2043_v58, %v1133_v29 }
0x106d   :  { %v1061_v30 = vpop.permute.xlu1 %1060 }
0x106e   :  { %1137 = vrot.lane.b32.xlu1 %v1135_v40, %s2103_s25  ;;  %v1063_v31 = vmul.f32 %v2045_v15, %v1061_v30  ;;  %v1213_v32 = vpack.c.bf16 %v1135_v40, %v1135_v40 }
0x1070   :  { %1141 = vrot.lane.b32.xlu0 %v1063_v31, %s2102_s3 }
0x1072   :  { %1215 = vrot.lane.b32.xlu1 %v1213_v32, %s2103_s25 }
0x10e0   :  { %v1138_v33 = vpop.permute.xlu1 %1137 }
0x10e2   :  { %v1142_v35 = vpop.permute.xlu0 %1141 }
0x10e3   :  { %v1144_v38 = vsel %vm289_vm3, %v1138_v33, %v1142_v35 }
0x10e4   :  { %v1216_v39 = vpop.permute.xlu1 %1215  ;;  %v1145_v37 = vpack.c.bf16 %v1144_v38, %v1144_v38 }
0x10e5   :  { %1898 = vmatmul.mubr.msk.bf16.vlgmr.msra.gmra.mrb[28].mxu0 %vm289_vm3, %v1216_v39 }
0x10e6   :  { %1902 = vmatpush3.bf16.msra.mxu0 %v2309_v63  ;;  %1909 = vmatprep.mubr.msk.bf16.mxu0 %vm2101_vm2, %v2100_v0  ;;  %v245_v63 = vadd.f32 %v2348_v18, %v2284_v36 }
0x10e7   :  { %1890 = vmatmul.mubr.msk.bf16.vlgmr.msra.gmra.mrb[24].mxu1 %vm396_vm4, %v1145_v37  ;;  %1903 = vmatprep.subr.bf16.mxu0 %v2100_v0 }
0x10e8   :  { %1914 = vmatpush3.bf16.msra.mxu1 %v2530_v55  ;;  %1917 = vmatprep.mubr.msk.bf16.mxu1 %vm2101_vm2, %v2100_v0 }
0x10e9   :  { %1915 = vmatprep.subr.bf16.mxu1 %v2100_v0 }
0x10ea   :  { %1904 = vmatpush3.bf16.msra.mxu0 %v2315_v41 }
0x10eb   :  { %1905 = vmatprep.subr.bf16.mxu0 %v2100_v0 }
0x10ec   :  { %1916 = vmatpush3.bf16.msra.mxu1 %v2541_v56 }
0x10ed   :  { %1921 = vmatprep.subr.bf16.mxu1 %v2100_v0 }
0x10ee   :  { %1906 = vmatpush3.bf16.msra.mxu0 %v2326_v10 }
0x10ef   :  { %1907 = vmatprep.subr.bf16.mxu0 %v2100_v0 }
0x10f2   :  { %1908 = vmatpush3.bf16.msra.mxu0 %v2339_v12 }
0x10f3   :  { %1933 = vmatprep.subr.bf16.mxu0 %v2100_v0 }
0x11b8   :  { %v1254_v44 = vpop.f32.mrb[28].mxu0 }
0x11b9   :  { %v1260_v45 = vadd.f32 %v1254_v44, %v245_v63  ;;  %v1899_v46 = vpop.f32.mrb[29].mxu0 }
0x11ba   :  { %v1183_v43 = vpop.f32.mrb[24].mxu1  ;;  %v1257_v48 = vpop.f32.mrb[30].mxu0 }
0x11bb   :  { %v1184_v49 = vadd.f32 %v2380_v34, %v1183_v43  ;;  %2050 = vtanh.f32 %v1260_v45  ;;  %v1891_v50 = vpop.f32.mrb[25].mxu1  ;;  %v1900_v51 = vpop.f32.mrb[31].mxu0  ;;  %v1677_v36 = vmul.f32 -1.442695, %v1260_v45 }
0x11bc   :  { %v1186_v52 = vpop.f32.mrb[26].mxu1 }
0x11bd   :  { %2052 = vtanh.f32 %v1184_v49  ;;  %v1892_v54 = vpop.f32.mrb[27].mxu1  ;;  %v1675_v18 = vmul.f32 -1.442695, %v1184_v49 }
0x11be   :  { %2054 = vpow2.f32 %v1677_v36 }
0x11bf   :  { %2056 = vpow2.f32 %v1675_v18 }
0x11c5   :  { %v2051_v55 = vpop.eup %2050 }
0x11c6   :  { %1270 = vrot.lane.b32.xlu1 %v2051_v55, %s2102_s3 }
0x11c7   :  { %v2053_v56 = vpop.eup %2052 }
0x11c8   :  { %1198 = vrot.lane.b32.xlu0 %v2053_v56, %s2102_s3  ;;  %v2055_v57 = vpop.eup %2054 }
0x11c9   :  { %v2057_v59 = vpop.eup %2056  ;;  %v1264_v60 = vadd.f32 1.0, %v2055_v57 }
0x11ca   :  { %v1192_v61 = vadd.f32 1.0, %v2057_v59 }
0x11cb   :  { %2058 = vrcp.f32 %v1264_v60 }
0x11cc   :  { %2060 = vrcp.f32 %v1192_v61 }
0x11d5   :  { %v2059_v62 = vpop.eup %2058 }
0x11d6   :  { %v2061_v5 = vpop.eup %2060  ;;  %v1268_v42 = vmul.f32 %v2059_v62, %v2557_v23 }
0x11d7   :  { %v1196_v21 = vmul.f32 %v2061_v5, %v2561_v26  ;;  %v248_v26 = vadd.f32 %v2099_v25, %v2352_v20 }
0x1238   :  { %v1271_v2 = vpop.permute.xlu1 %1270 }
0x1239   :  { %v1273_v3 = vmul.f32 %v2059_v62, %v1271_v2 }
0x123a   :  { %v1199_v6 = vpop.permute.xlu0 %1198 }
0x123b   :  { %v1201_v1 = vmul.f32 %v2061_v5, %v1199_v6  ;;  %1275 = vrot.lane.b32.xlu1 %v1273_v3, %s2103_s25 }
0x123d   :  { %1203 = vrot.lane.b32.xlu0 %v1201_v1, %s2103_s25 }
0x12ad   :  { %v1276_v47 = vpop.permute.xlu1 %1275 }
0x12ae   :  { %v2596_v7 = vadd.f32 %v1276_v47, %v1268_v42 }
0x12af   :  { %v1204_v53 = vpop.permute.xlu0 %1203 }
0x12b0   :  { %2062 = vtanh.f32 %v2596_v7  ;;  %v2600_v8 = vadd.f32 %v1204_v53, %v1196_v21 }
0x12b2   :  { %2064 = vtanh.f32 %v2600_v8 }
0x12ba   :  { %v2063_v4 = vpop.eup %2062 }
0x12bb   :  { %1281 = vrot.lane.b32.xlu1 %v2063_v4, %s2102_s3 }
0x12bc   :  { %v2065_v9 = vpop.eup %2064 }
0x12bd   :  { %1209 = vrot.lane.b32.xlu0 %v2065_v9, %s2102_s3 }
0x132d   :  { %v1282_v11 = vpop.permute.xlu1 %1281 }
0x132e   :  { %v1284_v58 = vmul.f32 %v2059_v62, %v1282_v11 }
0x132f   :  { %v1210_v13 = vpop.permute.xlu0 %1209 }
0x1330   :  { %v1212_v14 = vmul.f32 %v2061_v5, %v1210_v13  ;;  %1286 = vrot.lane.b32.xlu0 %v1284_v58, %s2103_s25  ;;  %v1362_v15 = vpack.c.bf16 %v1284_v58, %v1284_v58 }
0x1332   :  { %1290 = vrot.lane.b32.xlu1 %v1212_v14, %s2102_s3 }
0x1334   :  { %1364 = vrot.lane.b32.xlu0 %v1362_v15, %s2103_s25 }
0x13a2   :  { %v1287_v19 = vpop.permute.xlu0 %1286 }
0x13a4   :  { %v1291_v16 = vpop.permute.xlu1 %1290 }
0x13a5   :  { %v1293_v17 = vsel %vm289_vm3, %v1287_v19, %v1291_v16 }
0x13a6   :  { %v1294_v22 = vpack.c.bf16 %v1293_v17, %v1293_v17  ;;  %v1365_v23 = vpop.permute.xlu0 %1364  ;;  %v1685_v17 = vld [vmem:[%s2677_s11] ss:$0 sm:$0xff] }
0x13a7   :  { %1918 = vmatmul.mubr.msk.bf16.vlgmr.msra.gmra.mrb[28].mxu1 %vm289_vm3, %v1365_v23  ;;  %v1959_v23 = vld [vmem:[%s2678_s12 + $0x8] sm:$0xff]  }
0x13a8   :  { %1910 = vmatmul.mubr.msk.bf16.vlgmr.msra.gmra.mrb[32].mxu0 %vm396_vm4, %v1294_v22  ;;  %1922 = vmatpush3.bf16.msra.mxu1 %v2098_v24  ;;  %v1958_v22 = vld [vmem:[%s2678_s12] sm:$0xff]  }
0x13a9   :  { %1923 = vmatprep.subr.bf16.mxu1 %v2100_v0  ;;  %1929 = vmatprep.mubr.msk.bf16.mxu1 %vm2101_vm2, %v2100_v0 }
0x13aa   :  { %1937 = vmatprep.mubr.msk.bf16.mxu0 %vm2101_vm2, %v2100_v0  ;;  %1934 = vmatpush3.bf16.msra.mxu0 %v1958_v22 }
0x13ab   :  { %1935 = vmatprep.subr.bf16.mxu0 %v2100_v0 }
0x13ac   :  { %1924 = vmatpush3.bf16.msra.mxu1 %v2315_v41 }
0x13ad   :  { %1925 = vmatprep.subr.bf16.mxu1 %v2100_v0 }
0x13ae   :  { %1936 = vmatpush3.bf16.msra.mxu0 %v1959_v23 }
0x13b0   :  { %1926 = vmatpush3.bf16.msra.mxu1 %v2326_v10 }
0x13b1   :  { %1927 = vmatprep.subr.bf16.mxu1 %v2100_v0 }
0x13b4   :  { %1928 = vmatpush3.bf16.msra.mxu1 %v2339_v12 }
0x147a   :  { %v1403_v27 = vpop.f32.mrb[28].mxu1 }
0x147b   :  { %v1332_v28 = vpop.f32.mrb[32].mxu0  ;;  %v1409_v29 = vadd.f32 %v1403_v27, %v248_v26  ;;  %v1919_v40 = vpop.f32.mrb[29].mxu1 }
0x147c   :  { %v1333_v41 = vadd.f32 %v2380_v34, %v1332_v28  ;;  %v1911_v30 = vpop.f32.mrb[33].mxu0  ;;  %v1406_v31 = vpop.f32.mrb[30].mxu1 }
0x147d   :  { %2066 = vtanh.f32 %v1409_v29  ;;  %v1335_v10 = vpop.f32.mrb[34].mxu0  ;;  %v1920_v32 = vpop.f32.mrb[31].mxu1  ;;  %v1681_v20 = vmul.f32 -1.442695, %v1409_v29 }
0x147e   :  { %2068 = vtanh.f32 %v1333_v41  ;;  %v1912_v33 = vpop.f32.mrb[35].mxu0  ;;  %v1679_v38 = vmul.f32 -1.442695, %v1333_v41 }
0x147f   :  { %2070 = vpow2.f32 %v1681_v20 }
0x1480   :  { %2072 = vpow2.f32 %v1679_v38 }
0x1487   :  { %v2067_v12 = vpop.eup %2066 }
0x1488   :  { %v2069_v35 = vpop.eup %2068  ;;  %1419 = vrot.lane.b32.xlu0 %v2067_v12, %s2102_s3 }
0x1489   :  { %1347 = vrot.lane.b32.xlu1 %v2069_v35, %s2102_s3  ;;  %v2071_v39 = vpop.eup %2070 }
0x148a   :  { %v2073_v37 = vpop.eup %2072  ;;  %v1413_v63 = vadd.f32 1.0, %v2071_v39 }
0x148b   :  { %v1341_v44 = vadd.f32 1.0, %v2073_v37 }
0x148c   :  { %2074 = vrcp.f32 %v1413_v63 }
0x148d   :  { %2076 = vrcp.f32 %v1341_v44 }
0x1496   :  { %v2075_v45 = vpop.eup %2074 }
0x1497   :  { %v2077_v43 = vpop.eup %2076  ;;  %v1417_v51 = vmul.f32 %v2075_v45, %v2596_v7 }
0x1498   :  { %v1345_v52 = vmul.f32 %v2077_v43, %v2600_v8 }
0x14fa   :  { %v1420_v46 = vpop.permute.xlu0 %1419 }
0x14fb   :  { %v1348_v48 = vpop.permute.xlu1 %1347  ;;  %v1422_v49 = vmul.f32 %v2075_v45, %v1420_v46 }
0x14fc   :  { %v1350_v50 = vmul.f32 %v2077_v43, %v1348_v48 }
0x14fd   :  { %1424 = vrot.lane.b32.xlu0 %v1422_v49, %s2103_s25 }
0x14fe   :  { %1352 = vrot.lane.b32.xlu1 %v1350_v50, %s2103_s25 }
0x156f   :  { %v1425_v54 = vpop.permute.xlu0 %1424 }
0x1570   :  { %v1353_v55 = vpop.permute.xlu1 %1352  ;;  %v1427_v56 = vadd.f32 %v1425_v54, %v1417_v51 }
0x1571   :  { %v1355_v36 = vadd.f32 %v1353_v55, %v1345_v52  ;;  %v1686_v52 = vld [vmem:[%s2679_s13] ss:$0 sm:$0xff] }
0x1572   :  { %2078 = vtanh.f32 %v1427_v56 }
0x1573   :  { %2080 = vtanh.f32 %v1355_v36 }
0x157c   :  { %v2079_v18 = vpop.eup %2078 }
0x157d   :  { %v2081_v57 = vpop.eup %2080  ;;  %1430 = vrot.lane.b32.xlu0 %v2079_v18, %s2102_s3 }
0x157e   :  { %1358 = vrot.lane.b32.xlu1 %v2081_v57, %s2102_s3 }
0x15ef   :  { %v1431_v59 = vpop.permute.xlu0 %1430 }
0x15f0   :  { %v1359_v60 = vpop.permute.xlu1 %1358  ;;  %v1433_v61 = vmul.f32 %v2075_v45, %v1431_v59 }
0x15f1   :  { %v1361_v62 = vmul.f32 %v2077_v43, %v1359_v60 }
0x15f2   :  { %1435 = vrot.lane.b32.xlu1 %v1433_v61, %s2103_s25 }
0x15f3   :  { %1439 = vrot.lane.b32.xlu0 %v1361_v62, %s2102_s3 }
0x1664   :  { %v1436_v2 = vpop.permute.xlu1 %1435 }
0x1665   :  { %v1440_v3 = vpop.permute.xlu0 %1439 }
0x1666   :  { %v1442_v5 = vsel %vm289_vm3, %v1436_v2, %v1440_v3 }
0x1667   :  { %v1443_v6 = vpack.c.bf16 %v1442_v5, %v1442_v5 }
0x1669   :  { %1930 = vmatmul.mubr.msk.bf16.vlgmr.msra.gmra.mrb[32].mxu1 %vm396_vm4, %v1443_v6 }
0x173c   :  { %v1481_v1 = vpop.f32.mrb[32].mxu1 }
0x173d   :  { %v1482_v42 = vadd.f32 %v2380_v34, %v1481_v1  ;;  %v1931_v47 = vpop.f32.mrb[33].mxu1  ;;  %v1684_v34 = vld [vmem:[%s2676_s10] ss:$0 sm:$0xff] }
0x173e   :  { %v1484_v7 = vpop.f32.mrb[34].mxu1 }
0x173f   :  { %2082 = vtanh.f32 %v1482_v42  ;;  %v1932_v21 = vpop.f32.mrb[35].mxu1  ;;  %v1683_v8 = vmul.f32 -1.442695, %v1482_v42 }
0x1741   :  { %2084 = vpow2.f32 %v1683_v8 }
0x1749   :  { %v2083_v53 = vpop.eup %2082 }
0x174a   :  { %1496 = vrot.lane.b32.xlu1 %v2083_v53, %s2102_s3 }
0x174b   :  { %v2085_v4 = vpop.eup %2084 }
0x174c   :  { %v1490_v9 = vadd.f32 1.0, %v2085_v4 }
0x174e   :  { %2086 = vrcp.f32 %v1490_v9 }
0x1758   :  { %v2087_v11 = vpop.eup %2086 }
0x1759   :  { %v1494_v14 = vmul.f32 %v2087_v11, %v1355_v36 }
0x17bc   :  { %v1497_v58 = vpop.permute.xlu1 %1496 }
0x17bd   :  { %v1499_v13 = vmul.f32 %v2087_v11, %v1497_v58 }
0x17bf   :  { %1501 = vrot.lane.b32.xlu0 %v1499_v13, %s2103_s25 }
0x17c3   :  { %1540 = vrot.lane.b32.xlu0 %v1684_v34, %s2104_s26 }
0x1831   :  { %v1502_v15 = vpop.permute.xlu0 %1501 }
0x1832   :  { %v1504_v19 = vadd.f32 %v1502_v15, %v1494_v14 }
0x1834   :  { %2088 = vtanh.f32 %v1504_v19 }
0x1835   :  { %v1541_v45 = vpop.permute.xlu0 %1540 }
0x183e   :  { %v2089_v16 = vpop.eup %2088 }
0x183f   :  { %1507 = vrot.lane.b32.xlu1 %v2089_v16, %s2102_s3 }
0x1843   :  { %1550 = vrot.lane.b32.xlu1 %v1685_v17, %s2104_s26 }
0x18b1   :  { %v1508_v24 = vpop.permute.xlu1 %1507 }
0x18b2   :  { %v1510_v25 = vmul.f32 %v2087_v11, %v1508_v24 }
0x18b4   :  { %v1512_v26 = vsel %vm1511_vm5, %v1510_v25, 0.0 }
0x18b5   :  { %v1513_v27 = vrot.slane %v1512_v26, 4  ;;  %v1551_v43 = vpop.permute.xlu1 %1550 }
0x18b7   :  { %v1514_v28 = vadd.f32 %v1513_v27, %v1512_v26 }
0x18b9   :  { %v1515_v29 = vrot.slane %v1514_v28, 2 }
0x18bb   :  { %v1516_v40 = vadd.f32 %v1515_v29, %v1514_v28 }
0x18bd   :  { %v1517_v41 = vrot.slane %v1516_v40, 1 }
0x18bf   :  { %v1518_v30 = vadd.f32 %v1517_v41, %v1516_v40 }
0x18c1   :  { %v1520_v31 = vmul.f32 0.125, %v1518_v30 }
0x18c3   :  { %v1521_v10 = vsub.f32 %v1510_v25, %v1520_v31 }
0x18c5   :  { %v1522_v32 = vmul.f32 %v1521_v10, %v1521_v10 }
0x18c7   :  { %v1523_v33 = vsel %vm1511_vm5, %v1522_v32, 0.0 }
0x18c8   :  { %v1524_v12 = vrot.slane %v1523_v33, 4 }
0x18ca   :  { %v1525_v35 = vadd.f32 %v1524_v12, %v1523_v33 }
0x18cc   :  { %v1526_v20 = vrot.slane %v1525_v35, 2 }
0x18ce   :  { %v1527_v38 = vadd.f32 %v1526_v20, %v1525_v35 }
0x18d0   :  { %v1528_v0 = vrot.slane %v1527_v38, 1 }
0x18d2   :  { %v1529_v39 = vadd.f32 %v1528_v0, %v1527_v38 }
0x18d4   :  { %v1530_v37 = vmul.f32 0.125, %v1529_v39 }
0x18d6   :  { %v1531_v63 = vadd.f32 1e-05, %v1530_v37 }
0x18d8   :  { %2090 = vrsqrt.f32 %v1531_v63 }
0x18e2   :  { %v2091_v44 = vpop.eup %2090 }
0x18e3   :  { %v1533_v46 = vmul.f32 %v2091_v44, %v1521_v10 }
0x18e5   :  { %v1543_v48 = vmul.f32 %v1541_v45, %v1533_v46 }
0x18e7   :  { %v1553_v49 = vadd.f32 %v1551_v43, %v1543_v48 }
0x18e9   :  { %v1554_v50 = vpack.c.bf16 %v1553_v49, %v1553_v49 }
0x18eb   :  { %1567 = vrot.lane.b32.xlu0 %v1554_v50, %s2103_s25 }
0x195d   :  { %v1568_v51 = vpop.permute.xlu0 %1567 }
0x195e   :  { %1938 = vmatmul.mubr.msk.bf16.vlgmr.msra.gmra.mrb[36].mxu0 %vm289_vm3, %v1568_v51 }
0x1a31   :  { %v1618_v54 = vpop.f32.mrb[36].mxu0 }
0x1a32   :  { %v1619_v55 = vadd.f32 %v1686_v52, %v1618_v54  ;;  %v1939_v56 = vpop.f32.mrb[37].mxu0 }
0x1a33   :  { %v1621_v36 = vpop.f32.mrb[38].mxu0 }
0x1a34   :  { %v1690_v18 = vmul.f32 -1.442695, %v1619_v55  ;;  %v1940_v57 = vpop.f32.mrb[39].mxu0 }
0x1a36   :  { %2092 = vpow2.f32 %v1690_v18 }
0x1a40   :  { %v2093_v59 = vpop.eup %2092 }
0x1a41   :  { %v1627_v60 = vadd.f32 1.0, %v2093_v59 }
0x1a43   :  { %2094 = vrcp.f32 %v1627_v60 }
0x1a4d   :  { %v2095_v61 = vpop.eup %2094 }
0x1a4e   :  { %1631 = vst.msk [vmem:[%s2680_s14] sm:$0xff] %vm1630_vm6, %v2095_v61 }

</bundles_post_ra>
